<compile_context>
chip_gen: v7x
topology: tpu7x:2x2x1
jax: 0.10.0
libtpu: 0.0.40
codegen_flags: <defaults>
</compile_context>

<pallas_src>
import math
from functools import partial

import jax
import jax.numpy as jnp
from jax import lax
from jax.experimental import pallas as pl
from jax.experimental.pallas import tpu as pltpu

EPS = 1e-6
HEAD_SIZE = 8


# ------------------------------------------------------------------ kernel
def _encoder_kernel(x_ref, bn1g_ref, bn1b_ref, wqkv_ref, wo_ref,
                    bn2g_ref, bn2b_ref, w1_ref, b1_ref, w2_ref, b2_ref,
                    lastg_ref, lastb_ref, o_ref,
                    *, batch, seq, heads, att):
    l = pl.program_id(0)
    n_layers = pl.num_programs(0)
    hidden = heads * att

    # Layer 0: seed the resident output block (the layer-to-layer carry).
    @pl.when(l == 0)
    def _():
        o_ref[...] = x_ref[...]

    def batchnorm(z, g, b):
        # training-mode BatchNorm1d: batch stats, biased variance, eps=1e-6
        mean = jnp.mean(z, axis=0, keepdims=True)
        var = jnp.mean((z - mean) ** 2, axis=0, keepdims=True)
        return (z - mean) * lax.rsqrt(var + EPS) * g + b

    x = o_ref[...]                                           # (B*S, H) f32

    # ------------------------- self-attention sub-block -------------------
    y = batchnorm(x, bn1g_ref[0], bn1b_ref[0])               # (B*S, H) f32
    yb = y.astype(jnp.bfloat16)

    # Single fused QKV matmul over all rows (scale already folded into Wq).
    qkv = jnp.dot(yb, wqkv_ref[0],
                  preferred_element_type=jnp.float32)        # (B*S, 3H) f32
    qkvb = qkv.astype(jnp.bfloat16)
    q = qkvb[:, 0:hidden]
    k = qkvb[:, hidden:2 * hidden]
    v = qkvb[:, 2 * hidden:3 * hidden]

    def split_heads(t):
        # (B*S, H) -> (heads*B, S, att); leading index = h*B + b.
        parts = [t[:, h * att:(h + 1) * att] for h in range(heads)]
        return jnp.concatenate(parts, axis=0).reshape(heads * batch, seq, att)

    qh = split_heads(q)                                      # (heads*B, S, att) bf16
    kh = split_heads(k)
    vh = split_heads(v)

    # Batched scores over all (head, batch) pairs at once: (heads*B, S, S)
    s = lax.dot_general(qh, kh, (((2,), (2,)), ((0,), (0,))),
                        preferred_element_type=jnp.float32)
    s = s - jnp.max(s, axis=-1, keepdims=True)
    p = jnp.exp(s)
    p = p * pl.reciprocal(jnp.sum(p, axis=-1, keepdims=True), approx=True)

    # Batched p @ v: (heads*B, S, att)
    ctx = lax.dot_general(p.astype(jnp.bfloat16), vh,
                          (((2,), (1,)), ((0,), (0,))),
                          preferred_element_type=jnp.float32)

    # Reassemble a lane-dense (B*S, H) context, then ONE (B*S,H)@(H,H) matmul.
    ctx = ctx.reshape(heads, batch * seq, att)               # row = b*S + s
    ctx2d = jnp.concatenate([ctx[h] for h in range(heads)], axis=-1)  # (B*S, H)
    attn = jnp.dot(ctx2d.astype(jnp.bfloat16), wo_ref[0],
                   preferred_element_type=jnp.float32)       # (B*S, H)
    x = x + attn                                             # residual (dropout = id)

    # ------------------------- feed-forward sub-block ----------------------
    y = batchnorm(x, bn2g_ref[0], bn2b_ref[0])
    hid = jnp.dot(y.astype(jnp.bfloat16), w1_ref[0],
                  preferred_element_type=jnp.float32) + b1_ref[0]
    hid = jnp.maximum(hid, 0.0)
    ffn = jnp.dot(hid.astype(jnp.bfloat16), w2_ref[0],
                  preferred_element_type=jnp.float32) + b2_ref[0]
    x = x + ffn                                              # residual (dropout = id)

    # Single store per layer: carry to next layer, or final BatchNorm output.
    @pl.when(l < n_layers - 1)
    def _():
        o_ref[...] = x

    @pl.when(l == n_layers - 1)
    def _():
        o_ref[...] = batchnorm(x, lastg_ref[...], lastb_ref[...])


# ----------------------------------------------------------------- wrapper
def encoder_forward(x, params, head_size=HEAD_SIZE):
    B, S, H = x.shape
    L = params["wqkv"].shape[0]
    F = params["w1"].shape[-1]
    att = H // head_size
    x2d = x.reshape(B * S, H).astype(jnp.float32)

    kern = partial(_encoder_kernel, batch=B, seq=S, heads=head_size, att=att)
    out2d = pl.pallas_call(
        kern,
        grid=(L,),
        in_specs=[
            pl.BlockSpec((B * S, H), lambda l: (0, 0)),                 # x (resident)
            pl.BlockSpec((1, 1, H), lambda l: (l, 0, 0)),               # bn1 gamma
            pl.BlockSpec((1, 1, H), lambda l: (l, 0, 0)),               # bn1 beta
            pl.BlockSpec((1, H, 3 * H), lambda l: (l, 0, 0)),           # Wqkv^T (scaled)
            pl.BlockSpec((1, H, H), lambda l: (l, 0, 0)),               # Wo^T
            pl.BlockSpec((1, 1, H), lambda l: (l, 0, 0)),               # bn2 gamma
            pl.BlockSpec((1, 1, H), lambda l: (l, 0, 0)),               # bn2 beta
            pl.BlockSpec((1, H, F), lambda l: (l, 0, 0)),               # W1^T
            pl.BlockSpec((1, 1, F), lambda l: (l, 0, 0)),               # b1
            pl.BlockSpec((1, F, H), lambda l: (l, 0, 0)),               # W2^T
            pl.BlockSpec((1, 1, H), lambda l: (l, 0, 0)),               # b2
            pl.BlockSpec((1, H), lambda l: (0, 0)),                     # last gamma
            pl.BlockSpec((1, H), lambda l: (0, 0)),                     # last beta
        ],
        out_specs=pl.BlockSpec((B * S, H), lambda l: (0, 0)),           # resident carry
        out_shape=jax.ShapeDtypeStruct((B * S, H), jnp.float32),
        input_output_aliases={0: 0},            # x buffer reused as output buffer
        compiler_params=pltpu.CompilerParams(
            dimension_semantics=("arbitrary",)),  # layers are sequential (carry dep)
    )(x2d,
      params["bn1_g"], params["bn1_b"], params["wqkv"], params["wo"],
      params["bn2_g"], params["bn2_b"], params["w1"], params["b1"],
      params["w2"], params["b2"], params["last_g"], params["last_b"])
    return out2d.reshape(B, S, H)


# ------------------------------------------------------------- param init
def xavier_uniform(key, out_features, in_features):
    # torch Linear weight is (out, in); return (in, out) so kernels do x @ W^T.
    limit = math.sqrt(6.0 / (in_features + out_features))
    w = jax.random.uniform(key, (out_features, in_features), jnp.float32,
                           -limit, limit)
    return w.T


def init_params(key, hidden, filter_size, n_layers, head_size=HEAD_SIZE):
    att = hidden // head_size
    scale = att ** (-0.5)          # folded into Wq (exact: att is a power of 2)
    wqkv, wo, w1, w2 = [], [], [], []
    for _ in range(n_layers):
        key, *ks = jax.random.split(key, 7)
        wq_t = xavier_uniform(ks[0], hidden, hidden) * scale
        wk_t = xavier_uniform(ks[1], hidden, hidden)
        wv_t = xavier_uniform(ks[2], hidden, hidden)
        wo_t = xavier_uniform(ks[3], hidden, hidden)
        wqkv.append(jnp.concatenate([wq_t, wk_t, wv_t], axis=1))       # (H, 3H)
        wo.append(wo_t)                                                # (H, H)
        w1.append(xavier_uniform(ks[4], filter_size, hidden))          # (H, F)
        w2.append(xavier_uniform(ks[5], hidden, filter_size))          # (F, H)
    params = dict(
        bn1_g=jnp.ones((n_layers, 1, hidden), jnp.float32),
        bn1_b=jnp.zeros((n_layers, 1, hidden), jnp.float32),
        wqkv=jnp.stack(wqkv, 0).astype(jnp.bfloat16),
        wo=jnp.stack(wo, 0).astype(jnp.bfloat16),
        bn2_g=jnp.ones((n_layers, 1, hidden), jnp.float32),
        bn2_b=jnp.zeros((n_layers, 1, hidden), jnp.float32),
        w1=jnp.stack(w1, 0).astype(jnp.bfloat16),
        b1=jnp.zeros((n_layers, 1, filter_size), jnp.float32),
        w2=jnp.stack(w2, 0).astype(jnp.bfloat16),
        b2=jnp.zeros((n_layers, 1, hidden), jnp.float32),
        last_g=jnp.ones((1, hidden), jnp.float32),
        last_b=jnp.zeros((1, hidden), jnp.float32),
    )
    return params, key


if __name__ == "__main__":
    B, S, HIDDEN, FILTER, N_LAYERS = 2, 8, 32, 64, 2   # dropout_rate = 0.0
    root = jax.random.PRNGKey(0)
    kx, kp = jax.random.split(root)
    params, _ = init_params(kp, HIDDEN, FILTER, N_LAYERS)
    x = jax.random.normal(kx, (B, S, HIDDEN), jnp.float32)

    out = jax.jit(encoder_forward)(x, params)
    jax.block_until_ready(out)
    assert out.shape == (B, S, HIDDEN) and out.dtype == jnp.float32
    assert bool(jnp.all(jnp.isfinite(out)))
    print("KERNEL_OK")
</pallas_src>

<mosaic_0001>
module attributes {stable_mosaic.version = 11 : i64} {
  func.func @_encoder_kernel(%arg0: i32, %arg1: memref<16x32xf32, #tpu.memory_space<vmem>>, %arg2: memref<1x1x32xf32, #tpu.memory_space<vmem>>, %arg3: memref<1x1x32xf32, #tpu.memory_space<vmem>>, %arg4: memref<1x32x96xbf16, #tpu.memory_space<vmem>>, %arg5: memref<1x32x32xbf16, #tpu.memory_space<vmem>>, %arg6: memref<1x1x32xf32, #tpu.memory_space<vmem>>, %arg7: memref<1x1x32xf32, #tpu.memory_space<vmem>>, %arg8: memref<1x32x64xbf16, #tpu.memory_space<vmem>>, %arg9: memref<1x1x64xf32, #tpu.memory_space<vmem>>, %arg10: memref<1x64x32xbf16, #tpu.memory_space<vmem>>, %arg11: memref<1x1x32xf32, #tpu.memory_space<vmem>>, %arg12: memref<1x32xf32, #tpu.memory_space<vmem>>, %arg13: memref<1x32xf32, #tpu.memory_space<vmem>>, %arg14: memref<16x32xf32, #tpu.memory_space<vmem>>) attributes {dimension_semantics = [#tpu.dimension_semantics<arbitrary>], iteration_bounds = array<i64: 2>, scalar_prefetch = 0 : i64, scratch_operands = 0 : i64, tpu.core_type = #tpu.core_type<tc>, window_params = [{pipeline_mode = #tpu.pipeline_mode<synchronous>, transform_indices = @transform_0, window_bounds = array<i64: 16, 32>}, {transform_indices = @transform_1, window_bounds = array<i64: 1, 1, 32>}, {transform_indices = @transform_2, window_bounds = array<i64: 1, 1, 32>}, {transform_indices = @transform_3, window_bounds = array<i64: 1, 32, 96>}, {transform_indices = @transform_4, window_bounds = array<i64: 1, 32, 32>}, {transform_indices = @transform_5, window_bounds = array<i64: 1, 1, 32>}, {transform_indices = @transform_6, window_bounds = array<i64: 1, 1, 32>}, {transform_indices = @transform_7, window_bounds = array<i64: 1, 32, 64>}, {transform_indices = @transform_8, window_bounds = array<i64: 1, 1, 64>}, {transform_indices = @transform_9, window_bounds = array<i64: 1, 64, 32>}, {transform_indices = @transform_10, window_bounds = array<i64: 1, 1, 32>}, {pipeline_mode = #tpu.pipeline_mode<synchronous>, transform_indices = @transform_11, window_bounds = array<i64: 1, 32>}, {pipeline_mode = #tpu.pipeline_mode<synchronous>, transform_indices = @transform_12, window_bounds = array<i64: 1, 32>}, {pipeline_mode = #tpu.pipeline_mode<synchronous>, transform_indices = @transform_13, window_bounds = array<i64: 16, 32>}]} {
    %c0_i32 = arith.constant 0 : i32
    %0 = arith.cmpi eq, %arg0, %c0_i32 : i32
    %1 = arith.extui %0 : i1 to i32
    %c0_i32_0 = arith.constant 0 : i32
    %2 = arith.cmpi ne, %1, %c0_i32_0 : i32
    scf.if %2 {
      %c0_53 = arith.constant 0 : index
      %c0_54 = arith.constant 0 : index
      %155 = vector.load %arg1[%c0_53, %c0_54] : memref<16x32xf32, #tpu.memory_space<vmem>>, vector<16x32xf32>
      %c0_55 = arith.constant 0 : index
      %c0_56 = arith.constant 0 : index
      %156 = vector.load %arg14[%c0_55, %c0_56] : memref<16x32xf32, #tpu.memory_space<vmem>>, vector<16x32xf32>
      tpu.vector_store %arg14[%c0_55, %c0_56], %155 {strides = array<i32>} : memref<16x32xf32, #tpu.memory_space<vmem>>, vector<16x32xf32>,
    } else {
    }
    %c0 = arith.constant 0 : index
    %c0_1 = arith.constant 0 : index
    %3 = vector.load %arg14[%c0, %c0_1] : memref<16x32xf32, #tpu.memory_space<vmem>>, vector<16x32xf32>
    %c0_2 = arith.constant 0 : index
    %c0_3 = arith.constant 0 : index
    %c0_4 = arith.constant 0 : index
    %4 = vector.load %arg2[%c0_2, %c0_3, %c0_4] : memref<1x1x32xf32, #tpu.memory_space<vmem>>, vector<1x1x32xf32>
    %5 = vector.shape_cast %4 : vector<1x1x32xf32> to vector<1x32xf32>
    %c0_5 = arith.constant 0 : index
    %c0_6 = arith.constant 0 : index
    %c0_7 = arith.constant 0 : index
    %6 = vector.load %arg3[%c0_5, %c0_6, %c0_7] : memref<1x1x32xf32, #tpu.memory_space<vmem>>, vector<1x1x32xf32>
    %7 = vector.shape_cast %6 : vector<1x1x32xf32> to vector<1x32xf32>
    %cst = arith.constant dense<0.000000e+00> : vector<32xf32>
    %8 = vector.multi_reduction <add>, %3, %cst [0] : vector<16x32xf32> to vector<32xf32>
    %9 = vector.shape_cast %8 : vector<32xf32> to vector<1x32xf32>
    %cst_8 = arith.constant 1.600000e+01 : f32
    %10 = vector.broadcast %cst_8 : f32 to vector<1x32xf32>
    %11 = arith.divf %9, %10 : vector<1x32xf32>
    %12 = vector.broadcast %11 : vector<1x32xf32> to vector<16x32xf32>
    %13 = arith.subf %3, %12 : vector<16x32xf32>
    %14 = arith.mulf %13, %13 : vector<16x32xf32>
    %cst_9 = arith.constant dense<0.000000e+00> : vector<32xf32>
    %15 = vector.multi_reduction <add>, %14, %cst_9 [0] : vector<16x32xf32> to vector<32xf32>
    %16 = vector.shape_cast %15 : vector<32xf32> to vector<1x32xf32>
    %cst_10 = arith.constant 1.600000e+01 : f32
    %17 = vector.broadcast %cst_10 : f32 to vector<1x32xf32>
    %18 = arith.divf %16, %17 : vector<1x32xf32>
    %19 = vector.broadcast %11 : vector<1x32xf32> to vector<16x32xf32>
    %20 = arith.subf %3, %19 : vector<16x32xf32>
    %cst_11 = arith.constant 9.99999997E-7 : f32
    %21 = vector.broadcast %cst_11 : f32 to vector<1x32xf32>
    %22 = arith.addf %18, %21 : vector<1x32xf32>
    %23 = math.rsqrt %22 : vector<1x32xf32>
    %24 = vector.broadcast %23 : vector<1x32xf32> to vector<16x32xf32>
    %25 = arith.mulf %20, %24 : vector<16x32xf32>
    %26 = vector.broadcast %5 : vector<1x32xf32> to vector<16x32xf32>
    %27 = arith.mulf %25, %26 : vector<16x32xf32>
    %28 = vector.broadcast %7 : vector<1x32xf32> to vector<16x32xf32>
    %29 = arith.addf %27, %28 : vector<16x32xf32>
    %30 = arith.truncf %29 : vector<16x32xf32> to vector<16x32xbf16>
    %c0_12 = arith.constant 0 : index
    %c0_13 = arith.constant 0 : index
    %c0_14 = arith.constant 0 : index
    %31 = vector.load %arg4[%c0_12, %c0_13, %c0_14] : memref<1x32x96xbf16, #tpu.memory_space<vmem>>, vector<1x32x96xbf16>
    %32 = vector.shape_cast %31 : vector<1x32x96xbf16> to vector<32x96xbf16>
    %cst_15 = arith.constant dense<0.000000e+00> : vector<16x96xf32>
    %33 = tpu.matmul %30, %32, %cst_15 {dimension_numbers = #tpu.dot_dimension_numbers<[1], [0], [0], [1], [0, 0, 1, 1], [], []>} : vector<16x32xbf16>, vector<32x96xbf16>, vector<16x96xf32> -> vector<16x96xf32>
    %34 = arith.truncf %33 : vector<16x96xf32> to vector<16x96xbf16>
    %35 = vector.extract_strided_slice %34 {offsets = [0, 0], sizes = [16, 32], strides = [1, 1]} : vector<16x96xbf16> to vector<16x32xbf16>
    %36 = vector.extract_strided_slice %34 {offsets = [0, 32], sizes = [16, 32], strides = [1, 1]} : vector<16x96xbf16> to vector<16x32xbf16>
    %37 = vector.extract_strided_slice %34 {offsets = [0, 64], sizes = [16, 32], strides = [1, 1]} : vector<16x96xbf16> to vector<16x32xbf16>
    %38 = vector.extract_strided_slice %35 {offsets = [0, 0], sizes = [16, 4], strides = [1, 1]} : vector<16x32xbf16> to vector<16x4xbf16>
    %39 = vector.extract_strided_slice %35 {offsets = [0, 4], sizes = [16, 4], strides = [1, 1]} : vector<16x32xbf16> to vector<16x4xbf16>
    %40 = vector.extract_strided_slice %35 {offsets = [0, 8], sizes = [16, 4], strides = [1, 1]} : vector<16x32xbf16> to vector<16x4xbf16>
    %41 = vector.extract_strided_slice %35 {offsets = [0, 12], sizes = [16, 4], strides = [1, 1]} : vector<16x32xbf16> to vector<16x4xbf16>
    %42 = vector.extract_strided_slice %35 {offsets = [0, 16], sizes = [16, 4], strides = [1, 1]} : vector<16x32xbf16> to vector<16x4xbf16>
    %43 = vector.extract_strided_slice %35 {offsets = [0, 20], sizes = [16, 4], strides = [1, 1]} : vector<16x32xbf16> to vector<16x4xbf16>
    %44 = vector.extract_strided_slice %35 {offsets = [0, 24], sizes = [16, 4], strides = [1, 1]} : vector<16x32xbf16> to vector<16x4xbf16>
    %45 = vector.extract_strided_slice %35 {offsets = [0, 28], sizes = [16, 4], strides = [1, 1]} : vector<16x32xbf16> to vector<16x4xbf16>
    %46 = tpu.concatenate %38, %39, %40, %41, %42, %43, %44, %45 in 0 : vector<16x4xbf16>, vector<16x4xbf16>, vector<16x4xbf16>, vector<16x4xbf16>, vector<16x4xbf16>, vector<16x4xbf16>, vector<16x4xbf16>, vector<16x4xbf16> -> vector<128x4xbf16>
    %47 = vector.shape_cast %46 : vector<128x4xbf16> to vector<16x8x4xbf16>
    %48 = vector.extract_strided_slice %36 {offsets = [0, 0], sizes = [16, 4], strides = [1, 1]} : vector<16x32xbf16> to vector<16x4xbf16>
    %49 = vector.extract_strided_slice %36 {offsets = [0, 4], sizes = [16, 4], strides = [1, 1]} : vector<16x32xbf16> to vector<16x4xbf16>
    %50 = vector.extract_strided_slice %36 {offsets = [0, 8], sizes = [16, 4], strides = [1, 1]} : vector<16x32xbf16> to vector<16x4xbf16>
    %51 = vector.extract_strided_slice %36 {offsets = [0, 12], sizes = [16, 4], strides = [1, 1]} : vector<16x32xbf16> to vector<16x4xbf16>
    %52 = vector.extract_strided_slice %36 {offsets = [0, 16], sizes = [16, 4], strides = [1, 1]} : vector<16x32xbf16> to vector<16x4xbf16>
    %53 = vector.extract_strided_slice %36 {offsets = [0, 20], sizes = [16, 4], strides = [1, 1]} : vector<16x32xbf16> to vector<16x4xbf16>
    %54 = vector.extract_strided_slice %36 {offsets = [0, 24], sizes = [16, 4], strides = [1, 1]} : vector<16x32xbf16> to vector<16x4xbf16>
    %55 = vector.extract_strided_slice %36 {offsets = [0, 28], sizes = [16, 4], strides = [1, 1]} : vector<16x32xbf16> to vector<16x4xbf16>
    %56 = tpu.concatenate %48, %49, %50, %51, %52, %53, %54, %55 in 0 : vector<16x4xbf16>, vector<16x4xbf16>, vector<16x4xbf16>, vector<16x4xbf16>, vector<16x4xbf16>, vector<16x4xbf16>, vector<16x4xbf16>, vector<16x4xbf16> -> vector<128x4xbf16>
    %57 = vector.shape_cast %56 : vector<128x4xbf16> to vector<16x8x4xbf16>
    %58 = vector.extract_strided_slice %37 {offsets = [0, 0], sizes = [16, 4], strides = [1, 1]} : vector<16x32xbf16> to vector<16x4xbf16>
    %59 = vector.extract_strided_slice %37 {offsets = [0, 4], sizes = [16, 4], strides = [1, 1]} : vector<16x32xbf16> to vector<16x4xbf16>
    %60 = vector.extract_strided_slice %37 {offsets = [0, 8], sizes = [16, 4], strides = [1, 1]} : vector<16x32xbf16> to vector<16x4xbf16>
    %61 = vector.extract_strided_slice %37 {offsets = [0, 12], sizes = [16, 4], strides = [1, 1]} : vector<16x32xbf16> to vector<16x4xbf16>
    %62 = vector.extract_strided_slice %37 {offsets = [0, 16], sizes = [16, 4], strides = [1, 1]} : vector<16x32xbf16> to vector<16x4xbf16>
    %63 = vector.extract_strided_slice %37 {offsets = [0, 20], sizes = [16, 4], strides = [1, 1]} : vector<16x32xbf16> to vector<16x4xbf16>
    %64 = vector.extract_strided_slice %37 {offsets = [0, 24], sizes = [16, 4], strides = [1, 1]} : vector<16x32xbf16> to vector<16x4xbf16>
    %65 = vector.extract_strided_slice %37 {offsets = [0, 28], sizes = [16, 4], strides = [1, 1]} : vector<16x32xbf16> to vector<16x4xbf16>
    %66 = tpu.concatenate %58, %59, %60, %61, %62, %63, %64, %65 in 0 : vector<16x4xbf16>, vector<16x4xbf16>, vector<16x4xbf16>, vector<16x4xbf16>, vector<16x4xbf16>, vector<16x4xbf16>, vector<16x4xbf16>, vector<16x4xbf16> -> vector<128x4xbf16>
    %67 = vector.shape_cast %66 : vector<128x4xbf16> to vector<16x8x4xbf16>
    %cst_16 = arith.constant dense<0.000000e+00> : vector<16x8x8xf32>
    %68 = tpu.matmul %47, %57, %cst_16 {dimension_numbers = #tpu.dot_dimension_numbers<[2], [2], [1], [1], [0, 0, 0, 1, 1, 1], [0], [0]>} : vector<16x8x4xbf16>, vector<16x8x4xbf16>, vector<16x8x8xf32> -> vector<16x8x8xf32>
    %cst_17 = arith.constant dense<0xFF800000> : vector<16x8xf32>
    %69 = vector.multi_reduction <maximumf>, %68, %cst_17 [2] : vector<16x8x8xf32> to vector<16x8xf32>
    %70 = vector.shape_cast %69 : vector<16x8xf32> to vector<16x8x1xf32>
    %71 = vector.broadcast %70 : vector<16x8x1xf32> to vector<16x8x8xf32>
    %72 = arith.subf %68, %71 : vector<16x8x8xf32>
    %73 = math.exp %72 : vector<16x8x8xf32>
    %cst_18 = arith.constant dense<0.000000e+00> : vector<16x8xf32>
    %74 = vector.multi_reduction <add>, %73, %cst_18 [2] : vector<16x8x8xf32> to vector<16x8xf32>
    %75 = vector.shape_cast %74 : vector<16x8xf32> to vector<16x8x1xf32>
    %76 = tpu.reciprocal %75 {approx = true} : vector<16x8x1xf32> -> vector<16x8x1xf32>
    %77 = vector.broadcast %76 : vector<16x8x1xf32> to vector<16x8x8xf32>
    %78 = arith.mulf %73, %77 : vector<16x8x8xf32>
    %79 = arith.truncf %78 : vector<16x8x8xf32> to vector<16x8x8xbf16>
    %cst_19 = arith.constant dense<0.000000e+00> : vector<16x8x4xf32>
    %80 = tpu.matmul %79, %67, %cst_19 {dimension_numbers = #tpu.dot_dimension_numbers<[2], [1], [1], [2], [0, 0, 0, 1, 1, 2], [0], [0]>} : vector<16x8x8xbf16>, vector<16x8x4xbf16>, vector<16x8x4xf32> -> vector<16x8x4xf32>
    %81 = vector.shape_cast %80 : vector<16x8x4xf32> to vector<8x16x4xf32>
    %82 = vector.extract_strided_slice %81 {offsets = [0, 0, 0], sizes = [1, 16, 4], strides = [1, 1, 1]} : vector<8x16x4xf32> to vector<1x16x4xf32>
    %83 = vector.shape_cast %82 : vector<1x16x4xf32> to vector<16x4xf32>
    %84 = vector.extract_strided_slice %81 {offsets = [1, 0, 0], sizes = [1, 16, 4], strides = [1, 1, 1]} : vector<8x16x4xf32> to vector<1x16x4xf32>
    %85 = vector.shape_cast %84 : vector<1x16x4xf32> to vector<16x4xf32>
    %86 = vector.extract_strided_slice %81 {offsets = [2, 0, 0], sizes = [1, 16, 4], strides = [1, 1, 1]} : vector<8x16x4xf32> to vector<1x16x4xf32>
    %87 = vector.shape_cast %86 : vector<1x16x4xf32> to vector<16x4xf32>
    %88 = vector.extract_strided_slice %81 {offsets = [3, 0, 0], sizes = [1, 16, 4], strides = [1, 1, 1]} : vector<8x16x4xf32> to vector<1x16x4xf32>
    %89 = vector.shape_cast %88 : vector<1x16x4xf32> to vector<16x4xf32>
    %90 = vector.extract_strided_slice %81 {offsets = [4, 0, 0], sizes = [1, 16, 4], strides = [1, 1, 1]} : vector<8x16x4xf32> to vector<1x16x4xf32>
    %91 = vector.shape_cast %90 : vector<1x16x4xf32> to vector<16x4xf32>
    %92 = vector.extract_strided_slice %81 {offsets = [5, 0, 0], sizes = [1, 16, 4], strides = [1, 1, 1]} : vector<8x16x4xf32> to vector<1x16x4xf32>
    %93 = vector.shape_cast %92 : vector<1x16x4xf32> to vector<16x4xf32>
    %94 = vector.extract_strided_slice %81 {offsets = [6, 0, 0], sizes = [1, 16, 4], strides = [1, 1, 1]} : vector<8x16x4xf32> to vector<1x16x4xf32>
    %95 = vector.shape_cast %94 : vector<1x16x4xf32> to vector<16x4xf32>
    %96 = vector.extract_strided_slice %81 {offsets = [7, 0, 0], sizes = [1, 16, 4], strides = [1, 1, 1]} : vector<8x16x4xf32> to vector<1x16x4xf32>
    %97 = vector.shape_cast %96 : vector<1x16x4xf32> to vector<16x4xf32>
    %98 = tpu.concatenate %83, %85, %87, %89, %91, %93, %95, %97 in 1 : vector<16x4xf32>, vector<16x4xf32>, vector<16x4xf32>, vector<16x4xf32>, vector<16x4xf32>, vector<16x4xf32>, vector<16x4xf32>, vector<16x4xf32> -> vector<16x32xf32>
    %99 = arith.truncf %98 : vector<16x32xf32> to vector<16x32xbf16>
    %c0_20 = arith.constant 0 : index
    %c0_21 = arith.constant 0 : index
    %c0_22 = arith.constant 0 : index
    %100 = vector.load %arg5[%c0_20, %c0_21, %c0_22] : memref<1x32x32xbf16, #tpu.memory_space<vmem>>, vector<1x32x32xbf16>
    %101 = vector.shape_cast %100 : vector<1x32x32xbf16> to vector<32x32xbf16>
    %cst_23 = arith.constant dense<0.000000e+00> : vector<16x32xf32>
    %102 = tpu.matmul %99, %101, %cst_23 {dimension_numbers = #tpu.dot_dimension_numbers<[1], [0], [0], [1], [0, 0, 1, 1], [], []>} : vector<16x32xbf16>, vector<32x32xbf16>, vector<16x32xf32> -> vector<16x32xf32>
    %103 = arith.addf %3, %102 : vector<16x32xf32>
    %c0_24 = arith.constant 0 : index
    %c0_25 = arith.constant 0 : index
    %c0_26 = arith.constant 0 : index
    %104 = vector.load %arg6[%c0_24, %c0_25, %c0_26] : memref<1x1x32xf32, #tpu.memory_space<vmem>>, vector<1x1x32xf32>
    %105 = vector.shape_cast %104 : vector<1x1x32xf32> to vector<1x32xf32>
    %c0_27 = arith.constant 0 : index
    %c0_28 = arith.constant 0 : index
    %c0_29 = arith.constant 0 : index
    %106 = vector.load %arg7[%c0_27, %c0_28, %c0_29] : memref<1x1x32xf32, #tpu.memory_space<vmem>>, vector<1x1x32xf32>
    %107 = vector.shape_cast %106 : vector<1x1x32xf32> to vector<1x32xf32>
    %cst_30 = arith.constant dense<0.000000e+00> : vector<32xf32>
    %108 = vector.multi_reduction <add>, %103, %cst_30 [0] : vector<16x32xf32> to vector<32xf32>
    %109 = vector.shape_cast %108 : vector<32xf32> to vector<1x32xf32>
    %cst_31 = arith.constant 1.600000e+01 : f32
    %110 = vector.broadcast %cst_31 : f32 to vector<1x32xf32>
    %111 = arith.divf %109, %110 : vector<1x32xf32>
    %112 = vector.broadcast %111 : vector<1x32xf32> to vector<16x32xf32>
    %113 = arith.subf %103, %112 : vector<16x32xf32>
    %114 = arith.mulf %113, %113 : vector<16x32xf32>
    %cst_32 = arith.constant dense<0.000000e+00> : vector<32xf32>
    %115 = vector.multi_reduction <add>, %114, %cst_32 [0] : vector<16x32xf32> to vector<32xf32>
    %116 = vector.shape_cast %115 : vector<32xf32> to vector<1x32xf32>
    %cst_33 = arith.constant 1.600000e+01 : f32
    %117 = vector.broadcast %cst_33 : f32 to vector<1x32xf32>
    %118 = arith.divf %116, %117 : vector<1x32xf32>
    %119 = vector.broadcast %111 : vector<1x32xf32> to vector<16x32xf32>
    %120 = arith.subf %103, %119 : vector<16x32xf32>
    %cst_34 = arith.constant 9.99999997E-7 : f32
    %121 = vector.broadcast %cst_34 : f32 to vector<1x32xf32>
    %122 = arith.addf %118, %121 : vector<1x32xf32>
    %123 = math.rsqrt %122 : vector<1x32xf32>
    %124 = vector.broadcast %123 : vector<1x32xf32> to vector<16x32xf32>
    %125 = arith.mulf %120, %124 : vector<16x32xf32>
    %126 = vector.broadcast %105 : vector<1x32xf32> to vector<16x32xf32>
    %127 = arith.mulf %125, %126 : vector<16x32xf32>
    %128 = vector.broadcast %107 : vector<1x32xf32> to vector<16x32xf32>
    %129 = arith.addf %127, %128 : vector<16x32xf32>
    %130 = arith.truncf %129 : vector<16x32xf32> to vector<16x32xbf16>
    %c0_35 = arith.constant 0 : index
    %c0_36 = arith.constant 0 : index
    %c0_37 = arith.constant 0 : index
    %131 = vector.load %arg8[%c0_35, %c0_36, %c0_37] : memref<1x32x64xbf16, #tpu.memory_space<vmem>>, vector<1x32x64xbf16>
    %132 = vector.shape_cast %131 : vector<1x32x64xbf16> to vector<32x64xbf16>
    %cst_38 = arith.constant dense<0.000000e+00> : vector<16x64xf32>
    %133 = tpu.matmul %130, %132, %cst_38 {dimension_numbers = #tpu.dot_dimension_numbers<[1], [0], [0], [1], [0, 0, 1, 1], [], []>} : vector<16x32xbf16>, vector<32x64xbf16>, vector<16x64xf32> -> vector<16x64xf32>
    %c0_39 = arith.constant 0 : index
    %c0_40 = arith.constant 0 : index
    %c0_41 = arith.constant 0 : index
    %134 = vector.load %arg9[%c0_39, %c0_40, %c0_41] : memref<1x1x64xf32, #tpu.memory_space<vmem>>, vector<1x1x64xf32>
    %135 = vector.shape_cast %134 : vector<1x1x64xf32> to vector<1x64xf32>
    %136 = vector.broadcast %135 : vector<1x64xf32> to vector<16x64xf32>
    %137 = arith.addf %133, %136 : vector<16x64xf32>
    %cst_42 = arith.constant 0.000000e+00 : f32
    %138 = vector.broadcast %cst_42 : f32 to vector<16x64xf32>
    %139 = arith.maximumf %137, %138 : vector<16x64xf32>
    %140 = arith.truncf %139 : vector<16x64xf32> to vector<16x64xbf16>
    %c0_43 = arith.constant 0 : index
    %c0_44 = arith.constant 0 : index
    %c0_45 = arith.constant 0 : index
    %141 = vector.load %arg10[%c0_43, %c0_44, %c0_45] : memref<1x64x32xbf16, #tpu.memory_space<vmem>>, vector<1x64x32xbf16>
    %142 = vector.shape_cast %141 : vector<1x64x32xbf16> to vector<64x32xbf16>
    %cst_46 = arith.constant dense<0.000000e+00> : vector<16x32xf32>
    %143 = tpu.matmul %140, %142, %cst_46 {dimension_numbers = #tpu.dot_dimension_numbers<[1], [0], [0], [1], [0, 0, 1, 1], [], []>} : vector<16x64xbf16>, vector<64x32xbf16>, vector<16x32xf32> -> vector<16x32xf32>
    %c0_47 = arith.constant 0 : index
    %c0_48 = arith.constant 0 : index
    %c0_49 = arith.constant 0 : index
    %144 = vector.load %arg11[%c0_47, %c0_48, %c0_49] : memref<1x1x32xf32, #tpu.memory_space<vmem>>, vector<1x1x32xf32>
    %145 = vector.shape_cast %144 : vector<1x1x32xf32> to vector<1x32xf32>
    %146 = vector.broadcast %145 : vector<1x32xf32> to vector<16x32xf32>
    %147 = arith.addf %143, %146 : vector<16x32xf32>
    %148 = arith.addf %103, %147 : vector<16x32xf32>
    %c1_i32 = arith.constant 1 : i32
    %149 = arith.cmpi slt, %arg0, %c1_i32 : i32
    %150 = arith.extui %149 : i1 to i32
    %c0_i32_50 = arith.constant 0 : i32
    %151 = arith.cmpi ne, %150, %c0_i32_50 : i32
    scf.if %151 {
      %c0_53 = arith.constant 0 : index
      %c0_54 = arith.constant 0 : index
      %155 = vector.load %arg14[%c0_53, %c0_54] : memref<16x32xf32, #tpu.memory_space<vmem>>, vector<16x32xf32>
      tpu.vector_store %arg14[%c0_53, %c0_54], %148 {strides = array<i32>} : memref<16x32xf32, #tpu.memory_space<vmem>>, vector<16x32xf32>,
    } else {
    }
    %c1_i32_51 = arith.constant 1 : i32
    %152 = arith.cmpi eq, %arg0, %c1_i32_51 : i32
    %153 = arith.extui %152 : i1 to i32
    %c0_i32_52 = arith.constant 0 : i32
    %154 = arith.cmpi ne, %153, %c0_i32_52 : i32
    scf.if %154 {
      %c0_53 = arith.constant 0 : index
      %c0_54 = arith.constant 0 : index
      %155 = vector.load %arg12[%c0_53, %c0_54] : memref<1x32xf32, #tpu.memory_space<vmem>>, vector<1x32xf32>
      %c0_55 = arith.constant 0 : index
      %c0_56 = arith.constant 0 : index
      %156 = vector.load %arg13[%c0_55, %c0_56] : memref<1x32xf32, #tpu.memory_space<vmem>>, vector<1x32xf32>
      %cst_57 = arith.constant dense<0.000000e+00> : vector<32xf32>
      %157 = vector.multi_reduction <add>, %148, %cst_57 [0] : vector<16x32xf32> to vector<32xf32>
      %158 = vector.shape_cast %157 : vector<32xf32> to vector<1x32xf32>
      %cst_58 = arith.constant 1.600000e+01 : f32
      %159 = vector.broadcast %cst_58 : f32 to vector<1x32xf32>
      %160 = arith.divf %158, %159 : vector<1x32xf32>
      %161 = vector.broadcast %160 : vector<1x32xf32> to vector<16x32xf32>
      %162 = arith.subf %148, %161 : vector<16x32xf32>
      %163 = arith.mulf %162, %162 : vector<16x32xf32>
      %cst_59 = arith.constant dense<0.000000e+00> : vector<32xf32>
      %164 = vector.multi_reduction <add>, %163, %cst_59 [0] : vector<16x32xf32> to vector<32xf32>
      %165 = vector.shape_cast %164 : vector<32xf32> to vector<1x32xf32>
      %cst_60 = arith.constant 1.600000e+01 : f32
      %166 = vector.broadcast %cst_60 : f32 to vector<1x32xf32>
      %167 = arith.divf %165, %166 : vector<1x32xf32>
      %168 = vector.broadcast %160 : vector<1x32xf32> to vector<16x32xf32>
      %169 = arith.subf %148, %168 : vector<16x32xf32>
      %cst_61 = arith.constant 9.99999997E-7 : f32
      %170 = vector.broadcast %cst_61 : f32 to vector<1x32xf32>
      %171 = arith.addf %167, %170 : vector<1x32xf32>
      %172 = math.rsqrt %171 : vector<1x32xf32>
      %173 = vector.broadcast %172 : vector<1x32xf32> to vector<16x32xf32>
      %174 = arith.mulf %169, %173 : vector<16x32xf32>
      %175 = vector.broadcast %155 : vector<1x32xf32> to vector<16x32xf32>
      %176 = arith.mulf %174, %175 : vector<16x32xf32>
      %177 = vector.broadcast %156 : vector<1x32xf32> to vector<16x32xf32>
      %178 = arith.addf %176, %177 : vector<16x32xf32>
      %c0_62 = arith.constant 0 : index
      %c0_63 = arith.constant 0 : index
      %179 = vector.load %arg14[%c0_62, %c0_63] : memref<16x32xf32, #tpu.memory_space<vmem>>, vector<16x32xf32>
      tpu.vector_store %arg14[%c0_62, %c0_63], %178 {strides = array<i32>} : memref<16x32xf32, #tpu.memory_space<vmem>>, vector<16x32xf32>,
    } else {
    }
    return
  }
  func.func @transform_0(%arg0: i32) -> (i32, i32) {
    %c0_i32 = arith.constant 0 : i32
    %c0_i32_0 = arith.constant 0 : i32
    %c0_i32_1 = arith.constant 0 : i32
    return %c0_i32, %c0_i32_0 : i32, i32
  }
  func.func @transform_1(%arg0: i32) -> (i32, i32, i32) {
    %c0_i32 = arith.constant 0 : i32
    %c0_i32_0 = arith.constant 0 : i32
    %c0_i32_1 = arith.constant 0 : i32
    return %arg0, %c0_i32, %c0_i32_0 : i32, i32, i32
  }
  func.func @transform_2(%arg0: i32) -> (i32, i32, i32) {
    %c0_i32 = arith.constant 0 : i32
    %c0_i32_0 = arith.constant 0 : i32
    %c0_i32_1 = arith.constant 0 : i32
    return %arg0, %c0_i32, %c0_i32_0 : i32, i32, i32
  }
  func.func @transform_3(%arg0: i32) -> (i32, i32, i32) {
    %c0_i32 = arith.constant 0 : i32
    %c0_i32_0 = arith.constant 0 : i32
    %c0_i32_1 = arith.constant 0 : i32
    return %arg0, %c0_i32, %c0_i32_0 : i32, i32, i32
  }
  func.func @transform_4(%arg0: i32) -> (i32, i32, i32) {
    %c0_i32 = arith.constant 0 : i32
    %c0_i32_0 = arith.constant 0 : i32
    %c0_i32_1 = arith.constant 0 : i32
    return %arg0, %c0_i32, %c0_i32_0 : i32, i32, i32
  }
  func.func @transform_5(%arg0: i32) -> (i32, i32, i32) {
    %c0_i32 = arith.constant 0 : i32
    %c0_i32_0 = arith.constant 0 : i32
    %c0_i32_1 = arith.constant 0 : i32
    return %arg0, %c0_i32, %c0_i32_0 : i32, i32, i32
  }
  func.func @transform_6(%arg0: i32) -> (i32, i32, i32) {
    %c0_i32 = arith.constant 0 : i32
    %c0_i32_0 = arith.constant 0 : i32
    %c0_i32_1 = arith.constant 0 : i32
    return %arg0, %c0_i32, %c0_i32_0 : i32, i32, i32
  }
  func.func @transform_7(%arg0: i32) -> (i32, i32, i32) {
    %c0_i32 = arith.constant 0 : i32
    %c0_i32_0 = arith.constant 0 : i32
    %c0_i32_1 = arith.constant 0 : i32
    return %arg0, %c0_i32, %c0_i32_0 : i32, i32, i32
  }
  func.func @transform_8(%arg0: i32) -> (i32, i32, i32) {
    %c0_i32 = arith.constant 0 : i32
    %c0_i32_0 = arith.constant 0 : i32
    %c0_i32_1 = arith.constant 0 : i32
    return %arg0, %c0_i32, %c0_i32_0 : i32, i32, i32
  }
  func.func @transform_9(%arg0: i32) -> (i32, i32, i32) {
    %c0_i32 = arith.constant 0 : i32
    %c0_i32_0 = arith.constant 0 : i32
    %c0_i32_1 = arith.constant 0 : i32
    return %arg0, %c0_i32, %c0_i32_0 : i32, i32, i32
  }
  func.func @transform_10(%arg0: i32) -> (i32, i32, i32) {
    %c0_i32 = arith.constant 0 : i32
    %c0_i32_0 = arith.constant 0 : i32
    %c0_i32_1 = arith.constant 0 : i32
    return %arg0, %c0_i32, %c0_i32_0 : i32, i32, i32
  }
  func.func @transform_11(%arg0: i32) -> (i32, i32) {
    %c0_i32 = arith.constant 0 : i32
    %c0_i32_0 = arith.constant 0 : i32
    %c0_i32_1 = arith.constant 0 : i32
    return %c0_i32, %c0_i32_0 : i32, i32
  }
  func.func @transform_12(%arg0: i32) -> (i32, i32) {
    %c0_i32 = arith.constant 0 : i32
    %c0_i32_0 = arith.constant 0 : i32
    %c0_i32_1 = arith.constant 0 : i32
    return %c0_i32, %c0_i32_0 : i32, i32
  }
  func.func @transform_13(%arg0: i32) -> (i32, i32) {
    %c0_i32 = arith.constant 0 : i32
    %c0_i32_0 = arith.constant 0 : i32
    %c0_i32_1 = arith.constant 0 : i32
    return %c0_i32, %c0_i32_0 : i32, i32
  }
}

</mosaic_0001>

<bundles_post_ra>
// kernel: encoder_forward.1
= control target key start
LH: loop header
LB: loop body
LE: loop exit
PB: predicated region body
PF: predicated region fallthrough
CT: control target
= control target key end

     0   :  { %s3625_s25 = smov 0   ;;  %s4284_s0 = inlined_call_operand.vmem [shape: f32[16,32], index: 0, kind: input, shape index: {}, may-alias: {0,13}]   ;;  %s4285_s1 = inlined_call_operand.vmem [shape: f32[2,1,32], index: 1, kind: input, shape index: {}]   ;;  %s4286_s2 = inlined_call_operand.vmem [shape: f32[2,1,32], index: 2, kind: input, shape index: {}]   ;;  %s4287_s3 = inlined_call_operand.vmem [shape: bf16[2,32,96], index: 3, kind: input, shape index: {}]   ;;  %s4288_s4 = inlined_call_operand.vmem [shape: bf16[2,32,32], index: 4, kind: input, shape index: {}]   ;;  %s4289_s5 = inlined_call_operand.vmem [shape: f32[2,1,32], index: 5, kind: input, shape index: {}]   ;;  %s4290_s6 = inlined_call_operand.vmem [shape: f32[2,1,32], index: 6, kind: input, shape index: {}]   ;;  %s4291_s7 = inlined_call_operand.vmem [shape: bf16[2,32,64], index: 7, kind: input, shape index: {}]   ;;  %s4292_s8 = inlined_call_operand.vmem [shape: f32[2,1,64], index: 8, kind: input, shape index: {}]   ;;  %s4293_s9 = inlined_call_operand.vmem [shape: bf16[2,64,32], index: 9, kind: input, shape index: {}]   ;;  %s4294_s10 = inlined_call_operand.vmem [shape: f32[2,1,32], index: 10, kind: input, shape index: {}]   ;;  %s4295_s11 = inlined_call_operand.vmem [shape: f32[1,32], index: 11, kind: input, shape index: {}]   ;;  %s4296_s12 = inlined_call_operand.vmem [shape: f32[1,32], index: 12, kind: input, shape index: {}]   ;;  %s4297_s13 = inlined_call_operand.vmem [shape: f32[16,32], index: 13, kind: output, shape index: {}, may-alias: {0,13}]  }
   0x1   :  { %4299 = sst [smem:[#allocation3_spill]] %s4287_s3 }
   0x2   :  { %4300 = sst [smem:[#allocation4_spill]] %s4288_s4 }
   0x3   :  { %4301 = sst [smem:[#allocation5_spill]] %s4296_s12 }
   0x4 LB: > { %4302 = sst [smem:[#allocation2_spill]] %s3535_s25  ;;  %s3631_s26 = sadd.s32 4294967295, %s3535_s25   ;;  %s3535_s25 = sphi %s3625_s25, %s23_s25  }
   0x5   : > { %p2990_p0 = scmp.ge.s32.totalorder %s3535_s25, 1  ;;  %p460_p1 = scmp.lt.s32.totalorder %s3535_s25, 3 }
   0x7   : > { %p461_p2 = pnand %p2990_p0, %p460_p1 }
   0x8   : > { %p532_p3 = scmp.lt.s32.totalorder (!%p461_p2), %s3631_s26, 1  ;;  %s4303_s3 = sld [smem:[#allocation3_spill]] (!%p461_p2) }
   0x9   : > { %464 = sbr.rel (%p461_p2) target bundleno = 2269 (0x8dd), region = 72  ;;  %s4304_s4 = sld [smem:[#allocation4_spill]] (!%p461_p2) }
   0xa   : > { %p2999_p4 = scmp.ne.s32.totalorder (!%p461_p2), %s3631_s26, 0 }
  0x10   : > { %s3637_s27 = scalar_select %p532_p3, %s3631_s26, 1 }
  0x11   : > { %574 = sbr.rel (%p2999_p4) target bundleno = 24 (0x18), region = 76  ;;  %v575_v0 = vld [vmem:[%s4284_s0] sm:$0xff] (!%p2999_p4)  ;;  %vm577_vm0 = vcmask (!%p2999_p4), 261120   ;;  %v576_v1 = vld [vmem:[%s4284_s0 + $0x8] sm:$0xff] (!%p2999_p4) }
  0x12   : > { %s3074_s17 = sshll.u32 %s3637_s27, 4  ;;  %s553_s12 = scalar_lea.vmem %s4290_s6, %s3637_s27  ;;  %578 = vst.msk [vmem:[%s4297_s13] sm:$0xff] (!%p2999_p4), %vm577_vm0, %v575_v0  ;;  %579 = vst.msk [vmem:[%s4297_s13 + $0x8] sm:$0xff] (!%p2999_p4), %vm577_vm0, %v576_v1 }
  0x13   : > { %s542_s23 = scalar_lea.vmem %s4303_s3, %s3074_s17  ;;  %s3658_s29 = scalar_lea.vmem %s4304_s4, %s3074_s17 }
  0x14   : > { %s3667_s16 = scalar_lea.vmem %s4291_s7, %s3074_s17  ;;  %s561_s20 = scalar_lea.vmem %s4292_s8, %s3637_s27 }
  0x15   : > { %s3077_s21 = sshll.u32 %s3637_s27, 5  ;;  %s569_s25 = scalar_lea.vmem %s4294_s10, %s3637_s27 }
  0x16   : > { %s3677_s24 = scalar_lea.vmem %s4293_s9, %s3077_s21 }
  0x18 PF: > { %v3447_v2 = vld [vmem:[%s542_s23] sm:$0xff]   ;;  %v3537_v3 = vmov 0.0   ;;  %v3448_v4 = vld [vmem:[%s542_s23 + $0x8] sm:$0xff]   ;;  %vm3538_vm1 = vmmov 0   ;;  %vm584_vm2 = vcmask 261120   ;;  %s4305_s14 = scalar_lea.vmem %s4285_s1, %s3637_s27  ;;  %s4306_s3 = scalar_lea.vmem %s4286_s2, %s3637_s27  ;;  %vm741_vm3 = vcmask 31744  }
  0x19   : > { %3158 = vmatprep.subr.bf16.mxu0 %v3537_v3  ;;  %3166 = vmatprep.subr.bf16.mxu1 %v3537_v3  ;;  %v580_v5 = vld [vmem:[%s4297_s13] sm:$0xff]  ;;  %v581_v6 = vld [vmem:[%s4297_s13 + $0x8] sm:$0xff]  ;;  %s3539_s19 = smov 116   ;;  %s3540_s21 = smov 124   ;;  %vm1706_vm4 = vcmask 1043456   ;;  %vm1508_vm5 = vcmask 64512  }
  0x1a   : > { %3159 = vmatpush3.bf16.msra.mxu0 %v3447_v2  ;;  %3162 = vmatprep.mubr.msk.bf16.mxu0 %vm3538_vm1, %v3537_v3  ;;  %v585_v7 = vsel %vm584_vm2, %v580_v5, 0.0  ;;  %v586_v8 = vsel %vm584_vm2, %v581_v6, 0.0  ;;  %v3000_v33 = vld [vmem:[%s4305_s14] ss:$0 sm:$0xff]  ;;  %s3541_s4 = smov 112   ;;  %s3542_s22 = smov 120  }
  0x1b   : > { %3160 = vmatprep.subr.bf16.mxu0 %v3537_v3  ;;  %3168 = vmatprep.mubr.msk.bf16.mxu1 %vm3538_vm1, %v3537_v3  ;;  %v587_v9 = vadd.f32 %v586_v8, %v585_v7  ;;  %v3001_v36 = vld [vmem:[%s4306_s3] ss:$0 sm:$0xff]  ;;  %s3543_s28 = smov 104   ;;  %s3544_s30 = smov 108   ;;  %vm2530_vm6 = vcmask 97280   ;;  %vm2533_vm7 = vcmask 130048  }
  0x1c   : > { %s3545_s23 = smov 96   ;;  %s3546_s17 = smov 100   ;;  %vm2536_vm8 = vcmask 162816   ;;  %vm2539_vm9 = vcmask 195584   ;;  %vm2542_vm10 = vcmask 228352   ;;  %vm2764_vm11 = vcmask 523264  }
  0x1d   : > { %v588_v10 = vrot.slane %v587_v9, 4  ;;  %s3547_s14 = smov 64   ;;  %s3548_s15 = smov 4  }
  0x1e   : > { %3161 = vmatpush3.bf16.msra.mxu0 %v3448_v4  ;;  %s3549_s18 = smov 8   ;;  %s3550_s3 = smov 12  }
  0x1f   : > { %3172 = vmatprep.subr.bf16.mxu0 %v3537_v3  ;;  %v589_v11 = vadd.f32 %v588_v10, %v587_v9  ;;  %p3068_p5 = scmp.ge.s32.totalorder %s3631_s26, 1 }
  0x21   : > { %v590_v12 = vrot.slane %v589_v11, 2 }
  0x23   : > { %v591_v13 = vadd.f32 %v590_v12, %v589_v11 }
  0x25   : > { %v592_v14 = vrot.slane %v591_v13, 1 }
  0x27   : > { %v593_v15 = vadd.f32 %v592_v14, %v591_v13 }
  0x29   : > { %v595_v16 = vmul.f32 0.0625, %v593_v15 }
  0x2b   : > { %v596_v17 = vsub.f32 %v580_v5, %v595_v16  ;;  %v597_v18 = vsub.f32 %v581_v6, %v595_v16 }
  0x2d   : > { %v598_v19 = vmul.f32 %v596_v17, %v596_v17  ;;  %v599_v20 = vmul.f32 %v597_v18, %v597_v18 }
  0x2f   : > { %v600_v21 = vsel %vm584_vm2, %v598_v19, 0.0  ;;  %v601_v22 = vsel %vm584_vm2, %v599_v20, 0.0 }
  0x30   : > { %v602_v23 = vadd.f32 %v601_v22, %v600_v21 }
  0x32   : > { %v603_v24 = vrot.slane %v602_v23, 4 }
  0x34   : > { %v604_v25 = vadd.f32 %v603_v24, %v602_v23 }
  0x36   : > { %v605_v26 = vrot.slane %v604_v25, 2 }
  0x38   : > { %v606_v27 = vadd.f32 %v605_v26, %v604_v25 }
  0x3a   : > { %v607_v28 = vrot.slane %v606_v27, 1 }
  0x3c   : > { %v608_v29 = vadd.f32 %v607_v28, %v606_v27 }
  0x3e   : > { %v609_v30 = vmul.f32 0.0625, %v608_v29 }
  0x40   : > { %v610_v31 = vadd.f32 1e-06, %v609_v30 }
  0x42   : > { %3457 = vrsqrt.f32 %v610_v31 }
  0x4c   : > { %v3458_v32 = vpop.eup %3457 }
  0x4d   : > { %v612_v34 = vmul.f32 %v3458_v32, %v596_v17  ;;  %v613_v35 = vmul.f32 %v3458_v32, %v597_v18 }
  0x4f   : > { %v620_v37 = vmul.f32 %v3000_v33, %v612_v34  ;;  %v621_v38 = vmul.f32 %v3000_v33, %v613_v35 }
  0x51   : > { %v628_v39 = vadd.f32 %v3001_v36, %v620_v37  ;;  %v629_v40 = vadd.f32 %v3001_v36, %v621_v38 }
  0x53   : > { %v630_v41 = vpack.c.bf16 %v629_v40, %v628_v39 }
  0x55   : > { %3163 = vmatmul.mubr.msk.bf16.vlgmr.msra.gmra.mrb[0].mxu0 %vm584_vm2, %v630_v41 }
  0x56   : > { %3174 = vmatprep.mubr.msk.bf16.mxu0 %vm3538_vm1, %v3537_v3 }
 0x128   : > { %v684_v42 = vpop.f32.mrb[0].mxu0 }
 0x129   : > { %v3164_v43 = vpop.f32.mrb[1].mxu0  ;;  %v3078_v47 = vpack.c.bf16 %v684_v42, %v684_v42 }
 0x12a   : > { %v687_v44 = vpop.f32.mrb[2].mxu0 }
 0x12b   : > { %v691_v45 = vpack.c.bf16 %v687_v44, %v684_v42  ;;  %v3165_v46 = vpop.f32.mrb[3].mxu0  ;;  %v3079_v48 = vpack.c.bf16 %v687_v44, %v687_v44 }
 0x12d   : > { %697 = vrot.lane.b32.xlu1 %v691_v45, %s3539_s19  ;;  %693 = vrot.lane.b32.xlu0 %v691_v45, %s3540_s21  ;;  %s3551_s19 = smov 16   ;;  %s3552_s21 = smov 20  }
 0x131   : > { %699 = vrot.lane.b32.xlu1 %v691_v45, %s3541_s4  ;;  %695 = vrot.lane.b32.xlu0 %v691_v45, %s3542_s22  ;;  %s3553_s4 = smov 24  }
 0x135   : > { %703 = vrot.lane.b32.xlu1 %v691_v45, %s3543_s28  ;;  %701 = vrot.lane.b32.xlu0 %v691_v45, %s3544_s30 }
 0x139   : > { %739 = vrot.lane.b32.xlu1 %v3078_v47, %s3545_s23  ;;  %705 = vrot.lane.b32.xlu0 %v691_v45, %s3546_s17 }
 0x13d   : > { %788 = vrot.lane.b32.xlu0 %v3079_v48, %s3545_s23 }
 0x19f   : > { %v698_v49 = vpop.permute.xlu1 %697  ;;  %v694_v50 = vpop.permute.xlu0 %693 }
 0x1a0   : > { %v3729_v51 = vcombine.low %v694_v50, %v694_v50  ;;  %v3731_v52 = vcombine.high %v694_v50, %v694_v50  ;;  %v3745_v59 = vcombine.low %v698_v49, %v698_v49  ;;  %v3747_v60 = vcombine.high %v698_v49, %v698_v49 }
 0x1a2   : > { %884 = vrot.lane.b32.xlu0 %v3731_v52, %s3545_s23  ;;  %836 = vrot.lane.b32.xlu1 %v3729_v51, %s3545_s23 }
 0x1a3   : > { %v700_v53 = vpop.permute.xlu1 %699  ;;  %v696_v54 = vpop.permute.xlu0 %695 }
 0x1a4   : > { %v3737_v55 = vcombine.low %v696_v54, %v696_v54  ;;  %v3739_v56 = vcombine.high %v696_v54, %v696_v54  ;;  %v3753_v63 = vcombine.low %v700_v53, %v700_v53  ;;  %v3755_v0 = vcombine.high %v700_v53, %v700_v53 }
 0x1a6   : > { %980 = vrot.lane.b32.xlu0 %v3739_v56, %s3545_s23  ;;  %932 = vrot.lane.b32.xlu1 %v3737_v55, %s3545_s23 }
 0x1a7   : > { %v704_v57 = vpop.permute.xlu1 %703  ;;  %v702_v58 = vpop.permute.xlu0 %701 }
 0x1a8   : > { %v3763_v4 = vcombine.low %v702_v58, %v702_v58  ;;  %v3765_v5 = vcombine.high %v702_v58, %v702_v58  ;;  %v3773_v7 = vcombine.low %v704_v57, %v704_v57  ;;  %v3775_v8 = vcombine.high %v704_v57, %v704_v57 }
 0x1aa   : > { %1076 = vrot.lane.b32.xlu0 %v3747_v60, %s3545_s23  ;;  %1028 = vrot.lane.b32.xlu1 %v3745_v59, %s3545_s23 }
 0x1ab   : > { %v740_v61 = vpop.permute.xlu1 %739  ;;  %v706_v62 = vpop.permute.xlu0 %705 }
 0x1ac   : > { %v746_v1 = vsel %vm741_vm3, %v740_v61, 0  ;;  %v3784_v9 = vcombine.low %v706_v62, %v706_v62  ;;  %v3786_v10 = vcombine.high %v706_v62, %v706_v62 }
 0x1ad   : > { %3167 = vmatpush3.bf16.xpose.msra.mxu1 %v746_v1 }
 0x1ae   : > { %1172 = vrot.lane.b32.xlu0 %v3755_v0, %s3545_s23  ;;  %1124 = vrot.lane.b32.xlu1 %v3753_v63, %s3545_s23 }
 0x1af   : > { %v789_v2 = vpop.permute.xlu0 %788  ;;  %3178 = vmatprep.subr.bf16.mxu1 %v3537_v3 }
 0x1b0   : > { %v794_v6 = vsel %vm741_vm3, %v789_v2, 0 }
 0x1b1   : > { %3173 = vmatpush3.bf16.xpose.msra.mxu0 %v794_v6 }
 0x1b2   : > { %1268 = vrot.lane.b32.xlu0 %v3765_v5, %s3545_s23  ;;  %1220 = vrot.lane.b32.xlu1 %v3763_v4, %s3545_s23 }
 0x1b3   : > { %3184 = vmatprep.subr.bf16.mxu0 %v3537_v3 }
 0x1b4   : > { %3169 = vmatmul.mubr.msk.bf16.vlgmr.msra.gmra.mrb[0].mxu1 %vm741_vm3, %v3078_v47 }
 0x1b5   : > { %3180 = vmatprep.mubr.msk.bf16.mxu1 %vm3538_vm1, %v3537_v3 }
 0x1b6   : > { %1364 = vrot.lane.b32.xlu0 %v3775_v8, %s3545_s23  ;;  %1316 = vrot.lane.b32.xlu1 %v3773_v7, %s3545_s23 }
 0x1b8   : > { %3175 = vmatmul.mubr.msk.bf16.vlgmr.msra.gmra.mrb[4].mxu0 %vm741_vm3, %v3079_v48 }
 0x1b9   : > { %3186 = vmatprep.mubr.msk.bf16.mxu0 %vm3538_vm1, %v3537_v3 }
 0x1ba   : > { %1460 = vrot.lane.b32.xlu0 %v3786_v10, %s3545_s23  ;;  %1412 = vrot.lane.b32.xlu1 %v3784_v9, %s3545_s23 }
 0x1be   : > { %1701 = vrot.lane.b32.xlu0 %v3078_v47, %s3547_s14  ;;  %1750 = vrot.lane.b32.xlu1 %v3079_v48, %s3547_s14 }
 0x1c2   : > { %1798 = vrot.lane.b32.xlu0 %v3729_v51, %s3547_s14  ;;  %1846 = vrot.lane.b32.xlu1 %v3731_v52, %s3547_s14 }
 0x1c6   : > { %1894 = vrot.lane.b32.xlu0 %v3737_v55, %s3547_s14  ;;  %1942 = vrot.lane.b32.xlu1 %v3739_v56, %s3547_s14 }
 0x1ca   : > { %1990 = vrot.lane.b32.xlu0 %v3745_v59, %s3547_s14  ;;  %2038 = vrot.lane.b32.xlu1 %v3747_v60, %s3547_s14 }
 0x1ce   : > { %2086 = vrot.lane.b32.xlu0 %v3753_v63, %s3547_s14  ;;  %2134 = vrot.lane.b32.xlu1 %v3755_v0, %s3547_s14 }
 0x214   : > { %v837_v11 = vpop.permute.xlu1 %836  ;;  %v885_v12 = vpop.permute.xlu0 %884 }
 0x215   : > { %v842_v13 = vsel %vm741_vm3, %v837_v11, 0  ;;  %v890_v14 = vsel %vm741_vm3, %v885_v12, 0 }
 0x216   : > { %3179 = vmatpush3.bf16.xpose.msra.mxu1 %v842_v13  ;;  %3185 = vmatpush3.bf16.xpose.msra.mxu0 %v890_v14 }
 0x217   : > { %3190 = vmatprep.subr.bf16.mxu1 %v3537_v3  ;;  %3196 = vmatprep.subr.bf16.mxu0 %v3537_v3 }
 0x218   : > { %v933_v15 = vpop.permute.xlu1 %932  ;;  %v981_v16 = vpop.permute.xlu0 %980 }
 0x219   : > { %v938_v17 = vsel %vm741_vm3, %v933_v15, 0  ;;  %v986_v18 = vsel %vm741_vm3, %v981_v16, 0 }
 0x21c   : > { %v1029_v19 = vpop.permute.xlu1 %1028  ;;  %v1077_v20 = vpop.permute.xlu0 %1076 }
 0x21d   : > { %3181 = vmatmul.mubr.msk.bf16.vlgmr.msra.gmra.mrb[4].mxu1 %vm741_vm3, %v3729_v51  ;;  %3187 = vmatmul.mubr.msk.bf16.vlgmr.msra.gmra.mrb[8].mxu0 %vm741_vm3, %v3731_v52  ;;  %v1034_v21 = vsel %vm741_vm3, %v1029_v19, 0  ;;  %v1082_v22 = vsel %vm741_vm3, %v1077_v20, 0 }
 0x21e   : > { %3191 = vmatpush3.bf16.xpose.msra.mxu1 %v938_v17  ;;  %3197 = vmatpush3.bf16.xpose.msra.mxu0 %v986_v18 }
 0x21f   : > { %3192 = vmatprep.mubr.msk.bf16.mxu1 %vm3538_vm1, %v3537_v3  ;;  %3198 = vmatprep.mubr.msk.bf16.mxu0 %vm3538_vm1, %v3537_v3 }
 0x220   : > { %3202 = vmatprep.subr.bf16.mxu1 %v3537_v3  ;;  %3208 = vmatprep.subr.bf16.mxu0 %v3537_v3  ;;  %v1125_v23 = vpop.permute.xlu1 %1124  ;;  %v1173_v24 = vpop.permute.xlu0 %1172 }
 0x221   : > { %v1130_v25 = vsel %vm741_vm3, %v1125_v23, 0  ;;  %v1178_v26 = vsel %vm741_vm3, %v1173_v24, 0 }
 0x224   : > { %v1221_v27 = vpop.permute.xlu1 %1220  ;;  %v1269_v28 = vpop.permute.xlu0 %1268 }
 0x225   : > { %3193 = vmatmul.mubr.msk.bf16.vlgmr.msra.gmra.mrb[8].mxu1 %vm741_vm3, %v3737_v55  ;;  %3199 = vmatmul.mubr.msk.bf16.vlgmr.msra.gmra.mrb[12].mxu0 %vm741_vm3, %v3739_v56  ;;  %v1226_v29 = vsel %vm741_vm3, %v1221_v27, 0  ;;  %v1274_v30 = vsel %vm741_vm3, %v1269_v28, 0 }
 0x226   : > { %3203 = vmatpush3.bf16.xpose.msra.mxu1 %v1034_v21  ;;  %3209 = vmatpush3.bf16.xpose.msra.mxu0 %v1082_v22 }
 0x227   : > { %3204 = vmatprep.mubr.msk.bf16.mxu1 %vm3538_vm1, %v3537_v3  ;;  %3210 = vmatprep.mubr.msk.bf16.mxu0 %vm3538_vm1, %v3537_v3 }
 0x228   : > { %3214 = vmatprep.subr.bf16.mxu1 %v3537_v3  ;;  %3220 = vmatprep.subr.bf16.mxu0 %v3537_v3  ;;  %v1317_v31 = vpop.permute.xlu1 %1316  ;;  %v1365_v32 = vpop.permute.xlu0 %1364 }
 0x229   : > { %v1322_v33 = vsel %vm741_vm3, %v1317_v31, 0  ;;  %v1370_v34 = vsel %vm741_vm3, %v1365_v32, 0 }
 0x22c   : > { %v1413_v35 = vpop.permute.xlu1 %1412  ;;  %v1461_v36 = vpop.permute.xlu0 %1460 }
 0x22d   : > { %3205 = vmatmul.mubr.msk.bf16.vlgmr.msra.gmra.mrb[12].mxu1 %vm741_vm3, %v3745_v59  ;;  %3211 = vmatmul.mubr.msk.bf16.vlgmr.msra.gmra.mrb[16].mxu0 %vm741_vm3, %v3747_v60  ;;  %v1418_v37 = vsel %vm741_vm3, %v1413_v35, 0  ;;  %v1466_v38 = vsel %vm741_vm3, %v1461_v36, 0 }
 0x22e   : > { %3215 = vmatpush3.bf16.xpose.msra.mxu1 %v1130_v25  ;;  %3221 = vmatpush3.bf16.xpose.msra.mxu0 %v1178_v26 }
 0x22f   : > { %3216 = vmatprep.mubr.msk.bf16.mxu1 %vm3538_vm1, %v3537_v3  ;;  %3222 = vmatprep.mubr.msk.bf16.mxu0 %vm3538_vm1, %v3537_v3 }
 0x230   : > { %3226 = vmatprep.subr.bf16.mxu1 %v3537_v3  ;;  %3232 = vmatprep.subr.bf16.mxu0 %v3537_v3  ;;  %v1751_v39 = vpop.permute.xlu1 %1750  ;;  %v1702_v40 = vpop.permute.xlu0 %1701 }
 0x231   : > { %v1756_v41 = vsel %vm1706_vm4, %v1751_v39, 0  ;;  %v1708_v42 = vsel %vm1706_vm4, %v1702_v40, 0 }
 0x235   : > { %3217 = vmatmul.mubr.msk.bf16.vlgmr.msra.gmra.mrb[16].mxu1 %vm741_vm3, %v3753_v63  ;;  %3223 = vmatmul.mubr.msk.bf16.vlgmr.msra.gmra.mrb[20].mxu0 %vm741_vm3, %v3755_v0  ;;  %v3917_v63 = vpop.permute.xlu1 %1846 }
 0x236   : > { %3227 = vmatpush3.bf16.xpose.msra.mxu1 %v1226_v29  ;;  %3233 = vmatpush3.bf16.xpose.msra.mxu0 %v1274_v30 }
 0x237   : > { %3228 = vmatprep.mubr.msk.bf16.mxu1 %vm3538_vm1, %v3537_v3  ;;  %3234 = vmatprep.mubr.msk.bf16.mxu0 %vm3538_vm1, %v3537_v3 }
 0x238   : > { %3238 = vmatprep.subr.bf16.mxu1 %v3537_v3  ;;  %3244 = vmatprep.subr.bf16.mxu0 %v3537_v3 }
 0x239   : > { %v3927_v17 = vpop.permute.xlu1 %1942 }
 0x23d   : > { %3229 = vmatmul.mubr.msk.bf16.vlgmr.msra.gmra.mrb[20].mxu1 %vm741_vm3, %v3763_v4  ;;  %3235 = vmatmul.mubr.msk.bf16.vlgmr.msra.gmra.mrb[24].mxu0 %vm741_vm3, %v3765_v5  ;;  %v3937_v28 = vpop.permute.xlu1 %2038 }
 0x23e   : > { %3239 = vmatpush3.bf16.xpose.msra.mxu1 %v1322_v33  ;;  %3245 = vmatpush3.bf16.xpose.msra.mxu0 %v1370_v34 }
 0x23f   : > { %3240 = vmatprep.mubr.msk.bf16.mxu1 %vm3538_vm1, %v3537_v3  ;;  %3246 = vmatprep.mubr.msk.bf16.mxu0 %vm3538_vm1, %v3537_v3 }
 0x240   : > { %3250 = vmatprep.subr.bf16.mxu1 %v3537_v3  ;;  %3256 = vmatprep.subr.bf16.mxu0 %v3537_v3 }
 0x241   : > { %v3947_v39 = vpop.permute.xlu1 %2134 }
 0x245   : > { %3241 = vmatmul.mubr.msk.bf16.vlgmr.msra.gmra.mrb[24].mxu1 %vm741_vm3, %v3773_v7  ;;  %3247 = vmatmul.mubr.msk.bf16.vlgmr.msra.gmra.mrb[28].mxu0 %vm741_vm3, %v3775_v8 }
 0x246   : > { %3251 = vmatpush3.bf16.xpose.msra.mxu1 %v1418_v37  ;;  %3257 = vmatpush3.bf16.xpose.msra.mxu0 %v1466_v38 }
 0x247   : > { %3252 = vmatprep.mubr.msk.bf16.mxu1 %vm3538_vm1, %v3537_v3  ;;  %3258 = vmatprep.mubr.msk.bf16.mxu0 %vm3538_vm1, %v3537_v3 }
 0x248   : > { %3262 = vmatprep.subr.bf16.mxu1 %v3537_v3  ;;  %3268 = vmatprep.subr.bf16.mxu0 %v3537_v3 }
 0x24d   : > { %3253 = vmatmul.mubr.msk.bf16.vlgmr.msra.gmra.mrb[28].mxu1 %vm741_vm3, %v3784_v9  ;;  %3259 = vmatmul.mubr.msk.bf16.vlgmr.msra.gmra.mrb[32].mxu0 %vm741_vm3, %v3786_v10 }
 0x24e   : > { %3263 = vmatpush3.bf16.msra.mxu1 %v1708_v42  ;;  %3269 = vmatpush3.bf16.msra.mxu0 %v1756_v41 }
 0x24f   : > { %3264 = vmatprep.mubr.msk.bf16.mxu1 %vm3538_vm1, %v3537_v3  ;;  %3274 = vmatprep.subr.bf16.mxu1 %v3537_v3 }
 0x250   : > { %3270 = vmatprep.mubr.msk.bf16.mxu0 %vm3538_vm1, %v3537_v3  ;;  %3280 = vmatprep.subr.bf16.mxu0 %v3537_v3 }
 0x287   : > { %v3901_v43 = vpop.f32.mrb[0].mxu1 }
 0x288   : > { %v3170_v44 = vpop.f32.mrb[1].mxu1  ;;  %v1509_v45 = vsel %vm1508_vm5, %v3901_v43, -inf }
 0x289   : > { %v785_v46 = vpop.f32.mrb[2].mxu1  ;;  %1510 = vmax.xlane.f32.xlu1 %v1509_v45 }
 0x28a   : > { %v3171_v47 = vpop.f32.mrb[3].mxu1 }
 0x28b   : > { %v3905_v48 = vpop.f32.mrb[4].mxu0 }
 0x28c   : > { %v3176_v49 = vpop.f32.mrb[5].mxu0  ;;  %v1512_v50 = vsel %vm1508_vm5, %v3905_v48, -inf }
 0x28d   : > { %1513 = vmax.xlane.f32.xlu0 %v1512_v50  ;;  %v833_v51 = vpop.f32.mrb[6].mxu0 }
 0x28e   : > { %v3177_v52 = vpop.f32.mrb[7].mxu0 }
 0x2f0   : > { %v3909_v53 = vpop.f32.mrb[4].mxu1  ;;  %v3911_v54 = vpop.f32.mrb[8].mxu0 }
 0x2f1   : > { %v3182_v55 = vpop.f32.mrb[5].mxu1  ;;  %v3188_v56 = vpop.f32.mrb[9].mxu0  ;;  %v1515_v57 = vsel %vm1508_vm5, %v3909_v53, -inf  ;;  %v1518_v58 = vsel %vm1508_vm5, %v3911_v54, -inf }
 0x2f2   : > { %v881_v59 = vpop.f32.mrb[6].mxu1  ;;  %1516 = vmax.xlane.f32.xlu0 %v1515_v57  ;;  %1519 = vmax.xlane.f32.xlu1 %v1518_v58  ;;  %v929_v60 = vpop.f32.mrb[10].mxu0 }
 0x2f3   : > { %v3183_v61 = vpop.f32.mrb[7].mxu1  ;;  %v3189_v62 = vpop.f32.mrb[11].mxu0 }
 0x2f4   : > { %v3957_v55 = vpop.permute.xlu0 %1798 }
 0x2f8   : > { %v3919_v0 = vpop.f32.mrb[8].mxu1  ;;  %v3921_v1 = vpop.f32.mrb[12].mxu0 }
 0x2f9   : > { %v3194_v2 = vpop.f32.mrb[9].mxu1  ;;  %v3200_v6 = vpop.f32.mrb[13].mxu0  ;;  %v1521_v11 = vsel %vm1508_vm5, %v3919_v0, -inf  ;;  %v1524_v12 = vsel %vm1508_vm5, %v3921_v1, -inf }
 0x2fa   : > { %v977_v13 = vpop.f32.mrb[10].mxu1  ;;  %1522 = vmax.xlane.f32.xlu0 %v1521_v11  ;;  %1525 = vmax.xlane.f32.xlu1 %v1524_v12  ;;  %v1025_v14 = vpop.f32.mrb[14].mxu0 }
 0x2fb   : > { %v3195_v15 = vpop.f32.mrb[11].mxu1  ;;  %v3201_v16 = vpop.f32.mrb[15].mxu0 }
 0x2fc   : > { %v3964_v12 = vpop.permute.xlu0 %1894 }
 0x300   : > { %v3929_v18 = vpop.f32.mrb[12].mxu1  ;;  %v3931_v19 = vpop.f32.mrb[16].mxu0 }
 0x301   : > { %v3206_v20 = vpop.f32.mrb[13].mxu1  ;;  %v3212_v21 = vpop.f32.mrb[17].mxu0  ;;  %v1527_v22 = vsel %vm1508_vm5, %v3929_v18, -inf  ;;  %v1530_v23 = vsel %vm1508_vm5, %v3931_v19, -inf }
 0x302   : > { %v1073_v24 = vpop.f32.mrb[14].mxu1  ;;  %1528 = vmax.xlane.f32.xlu0 %v1527_v22  ;;  %1531 = vmax.xlane.f32.xlu1 %v1530_v23  ;;  %v1121_v25 = vpop.f32.mrb[18].mxu0 }
 0x303   : > { %v3207_v26 = vpop.f32.mrb[15].mxu1  ;;  %v3213_v27 = vpop.f32.mrb[19].mxu0 }
 0x304   : > { %v3976_v25 = vpop.permute.xlu0 %1990 }
 0x308   : > { %v3939_v29 = vpop.f32.mrb[16].mxu1  ;;  %v3941_v30 = vpop.f32.mrb[20].mxu0 }
 0x309   : > { %v3218_v31 = vpop.f32.mrb[17].mxu1  ;;  %v3224_v32 = vpop.f32.mrb[21].mxu0  ;;  %v1533_v33 = vsel %vm1508_vm5, %v3939_v29, -inf  ;;  %v1536_v34 = vsel %vm1508_vm5, %v3941_v30, -inf }
 0x30a   : > { %v1169_v35 = vpop.f32.mrb[18].mxu1  ;;  %1534 = vmax.xlane.f32.xlu0 %v1533_v33  ;;  %1537 = vmax.xlane.f32.xlu1 %v1536_v34  ;;  %v1217_v36 = vpop.f32.mrb[22].mxu0 }
 0x30b   : > { %v3219_v37 = vpop.f32.mrb[19].mxu1  ;;  %v3225_v38 = vpop.f32.mrb[23].mxu0 }
 0x30c   : > { %v3980_v27 = vpop.permute.xlu0 %2086 }
 0x310   : > { %v3949_v40 = vpop.f32.mrb[20].mxu1  ;;  %v3951_v41 = vpop.f32.mrb[24].mxu0 }
 0x311   : > { %v3230_v42 = vpop.f32.mrb[21].mxu1  ;;  %v3236_v44 = vpop.f32.mrb[25].mxu0  ;;  %v1539_v45 = vsel %vm1508_vm5, %v3949_v40, -inf  ;;  %v1542_v46 = vsel %vm1508_vm5, %v3951_v41, -inf }
 0x312   : > { %v1265_v47 = vpop.f32.mrb[22].mxu1  ;;  %1540 = vmax.xlane.f32.xlu0 %v1539_v45  ;;  %1543 = vmax.xlane.f32.xlu1 %v1542_v46  ;;  %v1313_v49 = vpop.f32.mrb[26].mxu0 }
 0x313   : > { %v3231_v50 = vpop.f32.mrb[23].mxu1  ;;  %v3237_v51 = vpop.f32.mrb[27].mxu0 }
 0x316   : > { %v1511_v52 = vpop.xlane.xlu1 %1510 }
 0x317   : > { %v1557_v56 = vsub.f32 %v3901_v43, %v1511_v52 }
 0x318   : > { %v3960_v57 = vpop.f32.mrb[24].mxu1  ;;  %v3962_v58 = vpop.f32.mrb[28].mxu0 }
 0x319   : > { %v1573_v59 = vmul.f32 1.442695, %v1557_v56  ;;  %v3242_v60 = vpop.f32.mrb[25].mxu1  ;;  %v3248_v61 = vpop.f32.mrb[29].mxu0  ;;  %v1545_v26 = vsel %vm1508_vm5, %v3960_v57, -inf  ;;  %v1548_v34 = vsel %vm1508_vm5, %v3962_v58, -inf }
 0x31a   : > { %v1361_v62 = vpop.f32.mrb[26].mxu1  ;;  %v1409_v2 = vpop.f32.mrb[30].mxu0 }
 0x31b   : > { %3459 = vpow2.f32 %v1573_v59  ;;  %v3243_v6 = vpop.f32.mrb[27].mxu1  ;;  %v3249_v11 = vpop.f32.mrb[31].mxu0 }
 0x320   : > { %v3966_v13 = vpop.f32.mrb[28].mxu1  ;;  %v3968_v14 = vpop.f32.mrb[32].mxu0 }
 0x321   : > { %v3254_v15 = vpop.f32.mrb[29].mxu1  ;;  %v3260_v43 = vpop.f32.mrb[33].mxu0  ;;  %v1551_v31 = vsel %vm1508_vm5, %v3966_v13, -inf  ;;  %v1554_v37 = vsel %vm1508_vm5, %v3968_v14, -inf }
 0x322   : > { %v1457_v16 = vpop.f32.mrb[30].mxu1  ;;  %v1505_v20 = vpop.f32.mrb[34].mxu0 }
 0x323   : > { %v3255_v21 = vpop.f32.mrb[31].mxu1  ;;  %2182 = vrot.lane.b32.xlu1 %v3763_v4, %s3547_s14  ;;  %v3261_v22 = vpop.f32.mrb[35].mxu0 }
 0x324   : > { %v1514_v4 = vpop.xlane.xlu0 %1513 }
 0x325   : > { %v3972_v23 = vpop.eup %3459  ;;  %v1558_v32 = vsub.f32 %v3905_v48, %v1514_v4 }
 0x326   : > { %v1605_v24 = vsel %vm1508_vm5, %v3972_v23, 0.0 }
 0x327   : > { %1606 = vadd.xlane.f32.xlu0 %v1605_v24  ;;  %v1575_v33 = vmul.f32 1.442695, %v1558_v32 }
 0x329   : > { %3461 = vpow2.f32 %v1575_v33 }
 0x32b   : > { %1546 = vmax.xlane.f32.xlu0 %v1545_v26 }
 0x32f   : > { %1552 = vmax.xlane.f32.xlu0 %v1551_v31 }
 0x333   : > { %v3989_v35 = vpop.eup %3461 }
 0x334   : > { %v1608_v36 = vsel %vm1508_vm5, %v3989_v35, 0.0 }
 0x345   : > { %2230 = vrot.lane.b32.xlu0 %v3765_v5, %s3547_s14 }
 0x347   : > { %1549 = vmax.xlane.f32.xlu1 %v1548_v34 }
 0x34b   : > { %1609 = vadd.xlane.f32.xlu1 %v1608_v36 }
 0x34f   : > { %1555 = vmax.xlane.f32.xlu1 %v1554_v37 }
 0x37f   : > { %v1517_v48 = vpop.xlane.xlu0 %1516  ;;  %v1520_v38 = vpop.xlane.xlu1 %1519 }
 0x380   : > { %v1559_v42 = vsub.f32 %v3909_v53, %v1517_v48  ;;  %v1560_v5 = vsub.f32 %v3911_v54, %v1520_v38 }
 0x382   : > { %v1577_v44 = vmul.f32 1.442695, %v1559_v42  ;;  %v1579_v45 = vmul.f32 1.442695, %v1560_v5 }
 0x384   : > { %3463 = vpow2.f32 %v1577_v44 }
 0x385   : > { %3465 = vpow2.f32 %v1579_v45 }
 0x387   : > { %v1523_v46 = vpop.xlane.xlu0 %1522  ;;  %v1526_v47 = vpop.xlane.xlu1 %1525 }
 0x388   : > { %v1561_v49 = vsub.f32 %v3919_v0, %v1523_v46  ;;  %v1562_v50 = vsub.f32 %v3921_v1, %v1526_v47  ;;  %v1804_v46 = vsel %vm1706_vm4, %v3957_v55, 0 }
 0x38a   : > { %v1581_v51 = vmul.f32 1.442695, %v1561_v49  ;;  %v1583_v52 = vmul.f32 1.442695, %v1562_v50 }
 0x38c   : > { %3467 = vpow2.f32 %v1581_v51 }
 0x38d   : > { %3469 = vpow2.f32 %v1583_v52 }
 0x38e   : > { %v3999_v56 = vpop.eup %3463 }
 0x38f   : > { %v4001_v59 = vpop.eup %3465  ;;  %v1529_v53 = vpop.xlane.xlu0 %1528  ;;  %v1611_v60 = vsel %vm1508_vm5, %v3999_v56, 0.0 }
 0x390   : > { %v1532_v54 = vpop.xlane.xlu1 %1531  ;;  %v1563_v61 = vsub.f32 %v3929_v18, %v1529_v53  ;;  %1612 = vadd.xlane.f32.xlu0 %v1611_v60  ;;  %v1614_v0 = vsel %vm1508_vm5, %v4001_v59, 0.0 }
 0x391   : > { %v1564_v62 = vsub.f32 %v3931_v19, %v1532_v54  ;;  %1615 = vadd.xlane.f32.xlu1 %v1614_v0 }
 0x392   : > { %v1585_v1 = vmul.f32 1.442695, %v1563_v61 }
 0x393   : > { %v1587_v2 = vmul.f32 1.442695, %v1564_v62 }
 0x394   : > { %3471 = vpow2.f32 %v1585_v1 }
 0x395   : > { %3473 = vpow2.f32 %v1587_v2 }
 0x396   : > { %v4009_v6 = vpop.eup %3467 }
 0x397   : > { %v4011_v11 = vpop.eup %3469  ;;  %v1535_v15 = vpop.xlane.xlu0 %1534  ;;  %v1617_v18 = vsel %vm1508_vm5, %v4009_v6, 0.0 }
 0x398   : > { %v1538_v43 = vpop.xlane.xlu1 %1537  ;;  %v1565_v19 = vsub.f32 %v3939_v29, %v1535_v15  ;;  %1618 = vadd.xlane.f32.xlu0 %v1617_v18  ;;  %v1620_v20 = vsel %vm1508_vm5, %v4011_v11, 0.0 }
 0x399   : > { %v1566_v16 = vsub.f32 %v3941_v30, %v1538_v43  ;;  %1621 = vadd.xlane.f32.xlu1 %v1620_v20  ;;  %v1852_v20 = vsel %vm1706_vm4, %v3917_v63, 0 }
 0x39a   : > { %v1589_v21 = vmul.f32 1.442695, %v1565_v19 }
 0x39b   : > { %v1591_v22 = vmul.f32 1.442695, %v1566_v16 }
 0x39c   : > { %3475 = vpow2.f32 %v1589_v21 }
 0x39d   : > { %3477 = vpow2.f32 %v1591_v22 }
 0x39e   : > { %v4019_v24 = vpop.eup %3471 }
 0x39f   : > { %v4021_v26 = vpop.eup %3473  ;;  %v1544_v31 = vpop.xlane.xlu1 %1543  ;;  %v1623_v4 = vsel %vm1508_vm5, %v4019_v24, 0.0 }
 0x3a0   : > { %v1568_v29 = vsub.f32 %v3951_v41, %v1544_v31  ;;  %1624 = vadd.xlane.f32.xlu0 %v1623_v4  ;;  %v1626_v30 = vsel %vm1508_vm5, %v4021_v26, 0.0  ;;  %v1541_v48 = vpop.xlane.xlu0 %1540 }
 0x3a1   : > { %1627 = vadd.xlane.f32.xlu1 %v1626_v30  ;;  %v1567_v49 = vsub.f32 %v3949_v40, %v1541_v48 }
 0x3a2   : > { %v1595_v32 = vmul.f32 1.442695, %v1568_v29 }
 0x3a3   : > { %v4054_v52 = vpop.permute.xlu1 %2182 }
 0x3a4   : > { %3479 = vpow2.f32 %v1595_v32 }
 0x3a6   : > { %v4028_v33 = vpop.eup %3475 }
 0x3a7   : > { %v4030_v34 = vpop.eup %3477  ;;  %v1629_v36 = vsel %vm1508_vm5, %v4028_v33, 0.0 }
 0x3a8   : > { %v1632_v37 = vsel %vm1508_vm5, %v4030_v34, 0.0  ;;  %1630 = vadd.xlane.f32.xlu1 %v1629_v36 }
 0x3a9   : > { %1633 = vadd.xlane.f32.xlu0 %v1632_v37 }
 0x3ae   : > { %v4036_v41 = vpop.eup %3479 }
 0x3af   : > { %v1638_v38 = vsel %vm1508_vm5, %v4036_v41, 0.0 }
 0x3b0   : > { %1639 = vadd.xlane.f32.xlu0 %v1638_v38 }
 0x3b4   : > { %v1607_v42 = vpop.xlane.xlu0 %1606 }
 0x3b5   : > { %3481 = vrcp.f32 %v1607_v42  ;;  %v1948_v42 = vsel %vm1706_vm4, %v3927_v17, 0 }
 0x3b8   : > { %v1547_v47 = vpop.xlane.xlu0 %1546 }
 0x3b9   : > { %2278 = vrot.lane.b32.xlu1 %v3773_v7, %s3547_s14  ;;  %v1593_v7 = vmul.f32 1.442695, %v1567_v49  ;;  %v2044_v49 = vsel %vm1706_vm4, %v3937_v28, 0 }
 0x3bb   : > { %3483 = vpow2.f32 %v1593_v7 }
 0x3bc   : > { %v1553_v50 = vpop.xlane.xlu0 %1552 }
 0x3bd   : > { %v1571_v51 = vsub.f32 %v3966_v13, %v1553_v50 }
 0x3bf   : > { %v3482_v5 = vpop.eup %3481  ;;  %v1601_v53 = vmul.f32 1.442695, %v1571_v51  ;;  %v2140_v51 = vsel %vm1706_vm4, %v3947_v39, 0 }
 0x3c0   : > { %v1669_v44 = vmul.f32 %v3482_v5, %v3972_v23  ;;  %v1569_v23 = vsub.f32 %v3960_v57, %v1547_v47  ;;  %v4089_v63 = vpop.permute.xlu0 %2230 }
 0x3c2   : > { %v1685_v45 = vpack.c.bf16 %v1669_v44, %v1669_v44  ;;  %v1597_v55 = vmul.f32 1.442695, %v1569_v23 }
 0x3c4   : > { %3265 = vmatmul.mubr.msk.bf16.vlgmr.msra.gmra.mrb[32].mxu1 %vm1508_vm5, %v1685_v45  ;;  %3485 = vpow2.f32 %v1597_v55  ;;  %v2092_v55 = vsel %vm1706_vm4, %v3980_v27, 0 }
 0x3c5   : > { %3275 = vmatpush3.bf16.msra.mxu1 %v1804_v46  ;;  %3276 = vmatprep.mubr.msk.bf16.mxu1 %vm3538_vm1, %v3537_v3  ;;  %3487 = vpow2.f32 %v1601_v53  ;;  %v4057_v62 = vpop.eup %3483  ;;  %v1996_v46 = vsel %vm1706_vm4, %v3976_v25, 0 }
 0x3c6   : > { %3286 = vmatprep.subr.bf16.mxu1 %v3537_v3  ;;  %2326 = vrot.lane.b32.xlu0 %v3775_v8, %s3547_s14  ;;  %v1635_v57 = vsel %vm1508_vm5, %v4057_v62, 0.0 }
 0x3ce   : > { %v4061_v0 = vpop.eup %3485 }
 0x3cf   : > { %v4066_v2 = vpop.eup %3487 }
 0x3d0   : > { %v1647_v19 = vsel %vm1508_vm5, %v4066_v2, 0.0 }
 0x3d4   : > { %v1550_v54 = vpop.xlane.xlu1 %1549 }
 0x3d5   : > { %v1570_v60 = vsub.f32 %v3962_v58, %v1550_v54  ;;  %v1641_v58 = vsel %vm1508_vm5, %v4061_v0, 0.0 }
 0x3d7   : > { %v1599_v40 = vmul.f32 1.442695, %v1570_v60 }
 0x3d8   : > { %v1610_v61 = vpop.xlane.xlu1 %1609 }
 0x3d9   : > { %3489 = vpow2.f32 %v1599_v40  ;;  %v2188_v40 = vsel %vm1706_vm4, %v4054_v52, 0 }
 0x3da   : > { %3491 = vrcp.f32 %v1610_v61  ;;  %v2236_v61 = vsel %vm1706_vm4, %v4089_v63, 0 }
 0x3dc   : > { %v1556_v8 = vpop.xlane.xlu1 %1555 }
 0x3dd   : > { %v1572_v13 = vsub.f32 %v3968_v14, %v1556_v8  ;;  %1636 = vadd.xlane.f32.xlu1 %v1635_v57 }
 0x3df   : > { %v1603_v1 = vmul.f32 1.442695, %v1572_v13 }
 0x3e1   : > { %3493 = vpow2.f32 %v1603_v1  ;;  %1642 = vadd.xlane.f32.xlu1 %v1641_v58 }
 0x3e3   : > { %v4068_v15 = vpop.eup %3489 }
 0x3e4   : > { %v3492_v43 = vpop.eup %3491  ;;  %v1644_v18 = vsel %vm1508_vm5, %v4068_v15, 0.0 }
 0x3e5   : > { %v1670_v14 = vmul.f32 %v3492_v43, %v3989_v35  ;;  %1648 = vadd.xlane.f32.xlu1 %v1647_v19  ;;  %1645 = vadd.xlane.f32.xlu0 %v1644_v18 }
 0x3e7   : > { %v1686_v16 = vpack.c.bf16 %v1670_v14, %v1670_v14 }
 0x3e9   : > { %3271 = vmatmul.mubr.msk.bf16.vlgmr.msra.gmra.mrb[36].mxu0 %vm1508_vm5, %v1686_v16 }
 0x3ea   : > { %3281 = vmatpush3.bf16.msra.mxu0 %v1852_v20  ;;  %3282 = vmatprep.mubr.msk.bf16.mxu0 %vm3538_vm1, %v3537_v3 }
 0x3eb   : > { %v4080_v21 = vpop.eup %3493  ;;  %3292 = vmatprep.subr.bf16.mxu0 %v3537_v3 }
 0x3ec   : > { %v1650_v22 = vsel %vm1508_vm5, %v4080_v21, 0.0 }
 0x3ed   : > { %1651 = vadd.xlane.f32.xlu0 %v1650_v22 }
 0x3f6   : > { %2374 = vrot.lane.b32.xlu1 %v3784_v9, %s3547_s14 }
 0x403   : > { %2422 = vrot.lane.b32.xlu0 %v3786_v10, %s3547_s14  ;;  %v1900_v10 = vsel %vm1706_vm4, %v3964_v12, 0  ;;  %s4307_s14 = scalar_lea.vmem %s4289_s5, %s3637_s27 }
 0x41d   : > { %v1613_v35 = vpop.xlane.xlu0 %1612 }
 0x41e   : > { %3495 = vrcp.f32 %v1613_v35  ;;  %v1616_v31 = vpop.xlane.xlu1 %1615 }
 0x41f   : > { %3497 = vrcp.f32 %v1616_v31 }
 0x425   : > { %v1619_v4 = vpop.xlane.xlu0 %1618 }
 0x426   : > { %3499 = vrcp.f32 %v1619_v4  ;;  %v1622_v29 = vpop.xlane.xlu1 %1621 }
 0x427   : > { %3501 = vrcp.f32 %v1622_v29 }
 0x428   : > { %v3496_v30 = vpop.eup %3495 }
 0x429   : > { %v3498_v32 = vpop.eup %3497  ;;  %v1671_v36 = vmul.f32 %v3496_v30, %v3999_v56 }
 0x42a   : > { %v1672_v37 = vmul.f32 %v3498_v32, %v4001_v59 }
 0x42b   : > { %v1687_v9 = vpack.c.bf16 %v1671_v36, %v1671_v36 }
 0x42c   : > { %v1688_v48 = vpack.c.bf16 %v1672_v37, %v1672_v37 }
 0x42d   : > { %3277 = vmatmul.mubr.msk.bf16.vlgmr.msra.gmra.mrb[36].mxu1 %vm1508_vm5, %v1687_v9  ;;  %v1625_v38 = vpop.xlane.xlu0 %1624 }
 0x42e   : > { %3287 = vmatpush3.bf16.msra.mxu1 %v1900_v10  ;;  %3503 = vrcp.f32 %v1625_v38  ;;  %3283 = vmatmul.mubr.msk.bf16.vlgmr.msra.gmra.mrb[40].mxu0 %vm1508_vm5, %v1688_v48  ;;  %v1628_v5 = vpop.xlane.xlu1 %1627 }
 0x42f   : > { %3293 = vmatpush3.bf16.msra.mxu0 %v1948_v42  ;;  %3505 = vrcp.f32 %v1628_v5  ;;  %3288 = vmatprep.mubr.msk.bf16.mxu1 %vm3538_vm1, %v3537_v3 }
 0x430   : > { %v3500_v56 = vpop.eup %3499  ;;  %3294 = vmatprep.mubr.msk.bf16.mxu0 %vm3538_vm1, %v3537_v3  ;;  %3298 = vmatprep.subr.bf16.mxu1 %v3537_v3 }
 0x431   : > { %v3502_v12 = vpop.eup %3501  ;;  %v1673_v59 = vmul.f32 %v3500_v56, %v4009_v6  ;;  %3304 = vmatprep.subr.bf16.mxu0 %v3537_v3 }
 0x432   : > { %v1674_v17 = vmul.f32 %v3502_v12, %v4011_v11 }
 0x433   : > { %v1689_v44 = vpack.c.bf16 %v1673_v59, %v1673_v59 }
 0x434   : > { %v1690_v45 = vpack.c.bf16 %v1674_v17, %v1674_v17 }
 0x435   : > { %3289 = vmatmul.mubr.msk.bf16.vlgmr.msra.gmra.mrb[40].mxu1 %vm1508_vm5, %v1689_v44  ;;  %v1631_v47 = vpop.xlane.xlu1 %1630 }
 0x436   : > { %3299 = vmatpush3.bf16.msra.mxu1 %v1996_v46  ;;  %v1634_v7 = vpop.xlane.xlu0 %1633  ;;  %3295 = vmatmul.mubr.msk.bf16.vlgmr.msra.gmra.mrb[44].mxu0 %vm1508_vm5, %v1690_v45  ;;  %3507 = vrcp.f32 %v1631_v47 }
 0x437   : > { %3509 = vrcp.f32 %v1634_v7  ;;  %3305 = vmatpush3.bf16.msra.mxu0 %v2044_v49  ;;  %3300 = vmatprep.mubr.msk.bf16.mxu1 %vm3538_vm1, %v3537_v3 }
 0x438   : > { %v3504_v6 = vpop.eup %3503  ;;  %3306 = vmatprep.mubr.msk.bf16.mxu0 %vm3538_vm1, %v3537_v3  ;;  %3310 = vmatprep.subr.bf16.mxu1 %v3537_v3 }
 0x439   : > { %v3506_v25 = vpop.eup %3505  ;;  %v1675_v11 = vmul.f32 %v3504_v6, %v4019_v24  ;;  %3316 = vmatprep.subr.bf16.mxu0 %v3537_v3  ;;  %v2279_v13 = vpop.permute.xlu1 %2278 }
 0x43a   : > { %v1676_v28 = vmul.f32 %v3506_v25, %v4021_v26  ;;  %v2284_v20 = vsel %vm1706_vm4, %v2279_v13, 0 }
 0x43b   : > { %v1691_v23 = vpack.c.bf16 %v1675_v11, %v1675_v11 }
 0x43c   : > { %v1692_v50 = vpack.c.bf16 %v1676_v28, %v1676_v28 }
 0x43d   : > { %3301 = vmatmul.mubr.msk.bf16.vlgmr.msra.gmra.mrb[44].mxu1 %vm1508_vm5, %v1691_v23  ;;  %v1640_v53 = vpop.xlane.xlu0 %1639 }
 0x43e   : > { %3311 = vmatpush3.bf16.msra.mxu1 %v2092_v55  ;;  %3307 = vmatmul.mubr.msk.bf16.vlgmr.msra.gmra.mrb[48].mxu0 %vm1508_vm5, %v1692_v50  ;;  %3511 = vrcp.f32 %v1640_v53 }
 0x43f   : > { %3317 = vmatpush3.bf16.msra.mxu0 %v2140_v51  ;;  %3312 = vmatprep.mubr.msk.bf16.mxu1 %vm3538_vm1, %v3537_v3 }
 0x440   : > { %v3508_v24 = vpop.eup %3507  ;;  %3318 = vmatprep.mubr.msk.bf16.mxu0 %vm3538_vm1, %v3537_v3  ;;  %3322 = vmatprep.subr.bf16.mxu1 %v3537_v3 }
 0x441   : > { %v3510_v27 = vpop.eup %3509  ;;  %v1677_v26 = vmul.f32 %v3508_v24, %v4028_v33  ;;  %3328 = vmatprep.subr.bf16.mxu0 %v3537_v3  ;;  %v2327_v52 = vpop.permute.xlu0 %2326 }
 0x442   : > { %v1678_v39 = vmul.f32 %v3510_v27, %v4030_v34  ;;  %v2332_v57 = vsel %vm1706_vm4, %v2327_v52, 0 }
 0x443   : > { %v1693_v54 = vpack.c.bf16 %v1677_v26, %v1677_v26 }
 0x444   : > { %v1694_v60 = vpack.c.bf16 %v1678_v39, %v1678_v39 }
 0x445   : > { %3313 = vmatmul.mubr.msk.bf16.vlgmr.msra.gmra.mrb[48].mxu1 %vm1508_vm5, %v1693_v54 }
 0x446   : > { %3319 = vmatmul.mubr.msk.bf16.vlgmr.msra.gmra.mrb[52].mxu0 %vm1508_vm5, %v1694_v60  ;;  %3323 = vmatpush3.bf16.msra.mxu1 %v2188_v40 }
 0x447   : > { %3329 = vmatpush3.bf16.msra.mxu0 %v2236_v61  ;;  %3330 = vmatprep.mubr.msk.bf16.mxu0 %vm3538_vm1, %v3537_v3 }
 0x448   : > { %3340 = vmatprep.subr.bf16.mxu0 %v3537_v3  ;;  %3324 = vmatprep.mubr.msk.bf16.mxu1 %vm3538_vm1, %v3537_v3  ;;  %v3512_v33 = vpop.eup %3511 }
 0x449   : > { %3334 = vmatprep.subr.bf16.mxu1 %v3537_v3  ;;  %v1680_v34 = vmul.f32 %v3512_v33, %v4036_v41 }
 0x44b   : > { %v1696_v8 = vpack.c.bf16 %v1680_v34, %v1680_v34 }
 0x44e   : > { %3331 = vmatmul.mubr.msk.bf16.vlgmr.msra.gmra.mrb[56].mxu0 %vm1508_vm5, %v1696_v8 }
 0x44f   : > { %3341 = vmatpush3.bf16.msra.mxu0 %v2332_v57  ;;  %3342 = vmatprep.mubr.msk.bf16.mxu0 %vm3538_vm1, %v3537_v3 }
 0x450   : > { %3352 = vmatprep.subr.bf16.mxu0 %v3537_v3 }
 0x46a   : > { %v1637_v1 = vpop.xlane.xlu1 %1636 }
 0x46b   : > { %3513 = vrcp.f32 %v1637_v1 }
 0x46e   : > { %v1643_v58 = vpop.xlane.xlu1 %1642 }
 0x46f   : > { %3515 = vrcp.f32 %v1643_v58 }
 0x472   : > { %v1646_v43 = vpop.xlane.xlu0 %1645  ;;  %v1649_v41 = vpop.xlane.xlu1 %1648 }
 0x473   : > { %3517 = vrcp.f32 %v1646_v43 }
 0x474   : > { %3519 = vrcp.f32 %v1649_v41 }
 0x475   : > { %v3514_v18 = vpop.eup %3513 }
 0x476   : > { %v1679_v19 = vmul.f32 %v3514_v18, %v4057_v62  ;;  %v2375_v31 = vpop.permute.xlu1 %2374 }
 0x477   : > { %v2380_v36 = vsel %vm1706_vm4, %v2375_v31, 0  ;;  %v3449_v31 = vld [vmem:[%s3658_s29] sm:$0xff]  }
 0x478   : > { %v1695_v14 = vpack.c.bf16 %v1679_v19, %v1679_v19 }
 0x479   : > { %v3516_v16 = vpop.eup %3515 }
 0x47a   : > { %v1652_v22 = vpop.xlane.xlu0 %1651  ;;  %3325 = vmatmul.mubr.msk.bf16.vlgmr.msra.gmra.mrb[52].mxu1 %vm1508_vm5, %v1695_v14  ;;  %v1681_v63 = vmul.f32 %v3516_v16, %v4061_v0 }
 0x47b   : > { %3521 = vrcp.f32 %v1652_v22  ;;  %3335 = vmatpush3.bf16.msra.mxu1 %v2284_v20  ;;  %3336 = vmatprep.mubr.msk.bf16.mxu1 %vm3538_vm1, %v3537_v3 }
 0x47c   : > { %3346 = vmatprep.subr.bf16.mxu1 %v3537_v3  ;;  %v1697_v29 = vpack.c.bf16 %v1681_v63, %v1681_v63 }
 0x47d   : > { %v3518_v35 = vpop.eup %3517 }
 0x47e   : > { %v1682_v62 = vmul.f32 %v3518_v35, %v4068_v15  ;;  %v2423_v4 = vpop.permute.xlu0 %2422  ;;  %v3520_v30 = vpop.eup %3519 }
 0x47f   : > { %v2428_v37 = vsel %vm1706_vm4, %v2423_v4, 0  ;;  %v1683_v0 = vmul.f32 %v3520_v30, %v4066_v2 }
 0x480   : > { %v1698_v32 = vpack.c.bf16 %v1682_v62, %v1682_v62 }
 0x481   : > { %v1699_v48 = vpack.c.bf16 %v1683_v0, %v1683_v0 }
 0x482   : > { %3337 = vmatmul.mubr.msk.bf16.vlgmr.msra.gmra.mrb[56].mxu1 %vm1508_vm5, %v1697_v29  ;;  %3343 = vmatmul.mubr.msk.bf16.vlgmr.msra.gmra.mrb[60].mxu0 %vm1508_vm5, %v1698_v32  ;;  %v3450_v32 = vld [vmem:[%s3658_s29 + $0x8] sm:$0xff]   ;;  %s3554_s29 = smov 28  }
 0x483   : > { %3347 = vmatpush3.bf16.msra.mxu1 %v2380_v36  ;;  %3353 = vmatpush3.bf16.msra.mxu0 %v2428_v37 }
 0x484   : > { %3348 = vmatprep.mubr.msk.bf16.mxu1 %vm3538_vm1, %v3537_v3  ;;  %3354 = vmatprep.mubr.msk.bf16.mxu0 %vm3538_vm1, %v3537_v3 }
 0x485   : > { %v3522_v15 = vpop.eup %3521  ;;  %3358 = vmatprep.subr.bf16.mxu1 %v3537_v3  ;;  %3366 = vmatprep.subr.bf16.mxu0 %v3537_v3 }
 0x486   : > { %v1684_v9 = vmul.f32 %v3522_v15, %v4080_v21 }
 0x488   : > { %v1700_v10 = vpack.c.bf16 %v1684_v9, %v1684_v9 }
 0x48a   : > { %3349 = vmatmul.mubr.msk.bf16.vlgmr.msra.gmra.mrb[60].mxu1 %vm1508_vm5, %v1699_v48  ;;  %3355 = vmatmul.mubr.msk.bf16.vlgmr.msra.gmra.mrb[64].mxu0 %vm1508_vm5, %v1700_v10 }
 0x48b   : > { %3362 = vmatprep.mubr.msk.bf16.mxu1 %vm3538_vm1, %v3537_v3  ;;  %3370 = vmatprep.mubr.msk.bf16.mxu0 %vm3538_vm1, %v3537_v3 }
 0x48c   : > { %3359 = vmatpush3.bf16.msra.mxu1 %v3449_v31  ;;  %v3525_v31 = vld [vmem:[%s4297_s13] sm:$0xff] }
 0x48d   : > { %3360 = vmatprep.subr.bf16.mxu1 %v3537_v3 }
 0x490   : > { %3361 = vmatpush3.bf16.msra.mxu1 %v3450_v32  ;;  %v3526_v32 = vld [vmem:[%s4297_s13 + $0x8] sm:$0xff] }
 0x491   : > { %3374 = vmatprep.subr.bf16.mxu1 %v3537_v3 }
 0x497   : > { %v4179_v2 = vpop.f32.mrb[32].mxu1 }
 0x498   : > { %v3266_v38 = vpop.f32.mrb[33].mxu1 }
 0x499   : > { %v1747_v42 = vpop.f32.mrb[34].mxu1 }
 0x49a   : > { %v3267_v5 = vpop.f32.mrb[35].mxu1 }
 0x4bc   : > { %v4181_v21 = vpop.f32.mrb[36].mxu0 }
 0x4bd   : > { %v3272_v56 = vpop.f32.mrb[37].mxu0 }
 0x4be   : > { %v1795_v12 = vpop.f32.mrb[38].mxu0 }
 0x4bf   : > { %v3273_v59 = vpop.f32.mrb[39].mxu0 }
 0x500   : > { %v1840_v17 = vpop.f32.mrb[36].mxu1 }
 0x501   : > { %v1888_v44 = vpop.f32.mrb[40].mxu0  ;;  %v3278_v45 = vpop.f32.mrb[37].mxu1 }
 0x502   : > { %v3412_v46 = vpack.i.bf16 %v1888_v44, %v1840_v17  ;;  %v3284_v47 = vpop.f32.mrb[41].mxu0  ;;  %v1843_v49 = vpop.f32.mrb[38].mxu1 }
 0x503   : > { %v1891_v7 = vpop.f32.mrb[42].mxu0  ;;  %v3279_v6 = vpop.f32.mrb[39].mxu1 }
 0x504   : > { %3413 = vrot.lane.b32.xlu1 %v3412_v46, %s3548_s15  ;;  %v3285_v25 = vpop.f32.mrb[43].mxu0 }
 0x508   : > { %v1936_v11 = vpop.f32.mrb[40].mxu1 }
 0x509   : > { %v1984_v28 = vpop.f32.mrb[44].mxu0  ;;  %v3290_v23 = vpop.f32.mrb[41].mxu1 }
 0x50a   : > { %v3417_v50 = vpack.i.bf16 %v1984_v28, %v1936_v11  ;;  %v3296_v55 = vpop.f32.mrb[45].mxu0  ;;  %v1939_v51 = vpop.f32.mrb[42].mxu1 }
 0x50b   : > { %v1987_v53 = vpop.f32.mrb[46].mxu0  ;;  %v3291_v24 = vpop.f32.mrb[43].mxu1 }
 0x50c   : > { %3418 = vrot.lane.b32.xlu0 %v3417_v50, %s3549_s18  ;;  %v3297_v27 = vpop.f32.mrb[47].mxu0 }
 0x510   : > { %v2032_v26 = vpop.f32.mrb[44].mxu1 }
 0x511   : > { %v2080_v39 = vpop.f32.mrb[48].mxu0  ;;  %v3302_v54 = vpop.f32.mrb[45].mxu1 }
 0x512   : > { %v3422_v60 = vpack.i.bf16 %v2080_v39, %v2032_v26  ;;  %v3308_v40 = vpop.f32.mrb[49].mxu0  ;;  %v2035_v61 = vpop.f32.mrb[46].mxu1 }
 0x513   : > { %v2083_v33 = vpop.f32.mrb[50].mxu0  ;;  %v3303_v34 = vpop.f32.mrb[47].mxu1 }
 0x514   : > { %3423 = vrot.lane.b32.xlu1 %v3422_v60, %s3550_s3  ;;  %v3309_v52 = vpop.f32.mrb[51].mxu0 }
 0x518   : > { %v2128_v8 = vpop.f32.mrb[48].mxu1 }
 0x519   : > { %v2176_v57 = vpop.f32.mrb[52].mxu0  ;;  %v3314_v13 = vpop.f32.mrb[49].mxu1 }
 0x51a   : > { %v3427_v1 = vpack.i.bf16 %v2176_v57, %v2128_v8  ;;  %v3320_v58 = vpop.f32.mrb[53].mxu0  ;;  %v2131_v43 = vpop.f32.mrb[50].mxu1 }
 0x51b   : > { %v2179_v41 = vpop.f32.mrb[54].mxu0  ;;  %v3315_v18 = vpop.f32.mrb[51].mxu1 }
 0x51c   : > { %3428 = vrot.lane.b32.xlu0 %v3427_v1, %s3551_s19  ;;  %v3321_v19 = vpop.f32.mrb[55].mxu0 }
 0x521   : > { %v2272_v14 = vpop.f32.mrb[56].mxu0 }
 0x522   : > { %v3332_v16 = vpop.f32.mrb[57].mxu0 }
 0x523   : > { %v2275_v20 = vpop.f32.mrb[58].mxu0 }
 0x524   : > { %v3333_v22 = vpop.f32.mrb[59].mxu0  ;;  %v3451_v20 = vld [vmem:[%s3667_s16] sm:$0xff]  }
 0x525   : > { %3367 = vmatpush3.bf16.msra.mxu0 %v3451_v20  ;;  %v3452_v22 = vld [vmem:[%s3667_s16 + $0x8] sm:$0xff]  }
 0x526   : > { %3368 = vmatprep.subr.bf16.mxu0 %v3537_v3 }
 0x529   : > { %3369 = vmatpush3.bf16.msra.mxu0 %v3452_v22 }
 0x54d   : > { %v2224_v63 = vpop.f32.mrb[52].mxu1 }
 0x54e   : > { %v3432_v35 = vpack.i.bf16 %v2272_v14, %v2224_v63  ;;  %v3326_v62 = vpop.f32.mrb[53].mxu1  ;;  %v3453_v63 = vld [vmem:[%s3677_s24] sm:$0xff]  }
 0x54f   : > { %v2227_v4 = vpop.f32.mrb[54].mxu1 }
 0x550   : > { %v3327_v29 = vpop.f32.mrb[55].mxu1  ;;  %3433 = vrot.lane.b32.xlu1 %v3432_v35, %s3552_s21  ;;  %v3454_v35 = vld [vmem:[%s3677_s24 + $0x8] sm:$0xff]  }
 0x555   : > { %v2320_v30 = vpop.f32.mrb[56].mxu1  ;;  %v2368_v36 = vpop.f32.mrb[60].mxu0 }
 0x556   : > { %v3338_v37 = vpop.f32.mrb[57].mxu1  ;;  %v3437_v0 = vpack.i.bf16 %v2368_v36, %v2320_v30  ;;  %v3344_v15 = vpop.f32.mrb[61].mxu0 }
 0x557   : > { %v2323_v9 = vpop.f32.mrb[58].mxu1  ;;  %v2371_v48 = vpop.f32.mrb[62].mxu0 }
 0x558   : > { %v3339_v10 = vpop.f32.mrb[59].mxu1  ;;  %3438 = vrot.lane.b32.xlu0 %v3437_v0, %s3553_s4  ;;  %v3345_v38 = vpop.f32.mrb[63].mxu0 }
 0x55d   : > { %v2416_v42 = vpop.f32.mrb[60].mxu1  ;;  %v2464_v5 = vpop.f32.mrb[64].mxu0 }
 0x55e   : > { %v3350_v56 = vpop.f32.mrb[61].mxu1  ;;  %v3442_v12 = vpack.i.bf16 %v2464_v5, %v2416_v42  ;;  %v3356_v59 = vpop.f32.mrb[65].mxu0 }
 0x55f   : > { %v2419_v17 = vpop.f32.mrb[62].mxu1  ;;  %v2467_v44 = vpop.f32.mrb[66].mxu0 }
 0x560   : > { %v3351_v45 = vpop.f32.mrb[63].mxu1  ;;  %3443 = vrot.lane.b32.xlu1 %v3442_v12, %s3554_s29  ;;  %v3357_v46 = vpop.f32.mrb[67].mxu0 }
 0x576   : > { %v3414_v47 = vpop.permute.xlu1 %3413 }
 0x577   : > { %v3416_v25 = vunpack.i.h.bf16 %v3414_v47  ;;  %v3415_v11 = vunpack.i.l.bf16 %v3414_v47 }
 0x579   : > { %v2527_v26 = vsel %vm741_vm3, %v4181_v21, %v3416_v25  ;;  %v2526_v39 = vsel %vm741_vm3, %v4179_v2, %v3415_v11 }
 0x57e   : > { %v3419_v49 = vpop.permute.xlu0 %3418 }
 0x57f   : > { %v3421_v28 = vunpack.i.h.bf16 %v3419_v49  ;;  %v3420_v23 = vunpack.i.l.bf16 %v3419_v49 }
 0x581   : > { %v2529_v40 = vsel %vm1508_vm5, %v2527_v26, %v3421_v28  ;;  %v2528_v61 = vsel %vm1508_vm5, %v2526_v39, %v3420_v23  ;;  %v3057_v26 = vld [vmem:[%s553_s12] ss:$0 sm:$0xff] }
 0x586   : > { %v3424_v7 = vpop.permute.xlu1 %3423 }
 0x587   : > { %v3426_v55 = vunpack.i.h.bf16 %v3424_v7  ;;  %v3425_v51 = vunpack.i.l.bf16 %v3424_v7 }
 0x589   : > { %v2532_v52 = vsel %vm2530_vm6, %v2529_v40, %v3426_v55  ;;  %v2531_v8 = vsel %vm2530_vm6, %v2528_v61, %v3425_v51 }
 0x58e   : > { %v3429_v6 = vpop.permute.xlu0 %3428 }
 0x58f   : > { %v3431_v24 = vunpack.i.h.bf16 %v3429_v6  ;;  %v3430_v27 = vunpack.i.l.bf16 %v3429_v6 }
 0x591   : > { %v2535_v57 = vsel %vm2533_vm7, %v2532_v52, %v3431_v24  ;;  %v2534_v21 = vsel %vm2533_vm7, %v2531_v8, %v3430_v27  ;;  %v3058_v52 = vld [vmem:[%s561_s20] ss:$0 sm:$0xff] }
 0x5c2   : > { %v3434_v50 = vpop.permute.xlu1 %3433 }
 0x5c3   : > { %v3436_v54 = vunpack.i.h.bf16 %v3434_v50  ;;  %v3435_v60 = vunpack.i.l.bf16 %v3434_v50 }
 0x5c5   : > { %v2538_v13 = vsel %vm2536_vm8, %v2535_v57, %v3436_v54  ;;  %v2537_v1 = vsel %vm2536_vm8, %v2534_v21, %v3435_v60 }
 0x5ca   : > { %v3439_v53 = vpop.permute.xlu0 %3438 }
 0x5cb   : > { %v3441_v33 = vunpack.i.h.bf16 %v3439_v53  ;;  %v3440_v34 = vunpack.i.l.bf16 %v3439_v53  ;;  %v3056_v53 = vld [vmem:[%s4307_s14] ss:$0 sm:$0xff] }
 0x5cd   : > { %v2541_v41 = vsel %vm2539_vm9, %v2538_v13, %v3441_v33  ;;  %v2540_v18 = vsel %vm2539_vm9, %v2537_v1, %v3440_v34  ;;  %v3455_v33 = vld [vmem:[%s3677_s24 + $0x10] sm:$0xff]   ;;  %v3456_v34 = vld [vmem:[%s3677_s24 + $0x18] sm:$0xff]  }
 0x5d2   : > { %v3444_v2 = vpop.permute.xlu1 %3443 }
 0x5d3   : > { %v3446_v58 = vunpack.i.h.bf16 %v3444_v2  ;;  %v3445_v43 = vunpack.i.l.bf16 %v3444_v2 }
 0x5d5   : > { %v2544_v19 = vsel %vm2542_vm10, %v2541_v41, %v3446_v58  ;;  %v2543_v14 = vsel %vm2542_vm10, %v2540_v18, %v3445_v43 }
 0x5d6   : > { %v2545_v16 = vpack.c.bf16 %v2544_v19, %v2543_v14 }
 0x5d8   : > { %3363 = vmatmul.mubr.msk.bf16.vlgmr.msra.gmra.mrb[64].mxu1 %vm584_vm2, %v2545_v16 }
 0x5d9   : > { %3382 = vmatprep.mubr.msk.bf16.mxu1 %vm3538_vm1, %v3537_v3  ;;  %3375 = vmatpush3.bf16.msra.mxu1 %v3453_v63 }
 0x5da   : > { %3376 = vmatprep.subr.bf16.mxu1 %v3537_v3 }
 0x5dd   : > { %3377 = vmatpush3.bf16.msra.mxu1 %v3454_v35 }
 0x5de   : > { %3378 = vmatprep.subr.bf16.mxu1 %v3537_v3 }
 0x5e1   : > { %3379 = vmatpush3.bf16.msra.mxu1 %v3455_v33 }
 0x5e2   : > { %3380 = vmatprep.subr.bf16.mxu1 %v3537_v3  ;;  %v3062_v3 = vld [vmem:[%s569_s25] ss:$0 sm:$0xff] }
 0x5e5   : > { %3381 = vmatpush3.bf16.msra.mxu1 %v3456_v34 }
 0x6ab   : > { %v2599_v62 = vpop.f32.mrb[64].mxu1 }
 0x6ac   : > { %v4212_v4 = vadd.f32 %v3525_v31, %v2599_v62  ;;  %v3364_v29 = vpop.f32.mrb[65].mxu1 }
 0x6ad   : > { %v2602_v30 = vpop.f32.mrb[66].mxu1 }
 0x6ae   : > { %v4217_v36 = vadd.f32 %v3526_v32, %v2602_v30  ;;  %v3365_v37 = vpop.f32.mrb[67].mxu1  ;;  %v2610_v0 = vsel %vm584_vm2, %v4212_v4, 0.0 }
 0x6b0   : > { %v2611_v15 = vsel %vm584_vm2, %v4217_v36, 0.0 }
 0x6b1   : > { %v2612_v9 = vadd.f32 %v2611_v15, %v2610_v0 }
 0x6b3   : > { %v2613_v48 = vrot.slane %v2612_v9, 4 }
 0x6b5   : > { %v2614_v10 = vadd.f32 %v2613_v48, %v2612_v9 }
 0x6b7   : > { %v2615_v38 = vrot.slane %v2614_v10, 2 }
 0x6b9   : > { %v2616_v42 = vadd.f32 %v2615_v38, %v2614_v10 }
 0x6bb   : > { %v2617_v5 = vrot.slane %v2616_v42, 1 }
 0x6bd   : > { %v2618_v56 = vadd.f32 %v2617_v5, %v2616_v42 }
 0x6bf   : > { %v2619_v12 = vmul.f32 0.0625, %v2618_v56 }
 0x6c1   : > { %v2620_v59 = vsub.f32 %v4212_v4, %v2619_v12  ;;  %v2621_v17 = vsub.f32 %v4217_v36, %v2619_v12 }
 0x6c3   : > { %v2622_v44 = vmul.f32 %v2620_v59, %v2620_v59  ;;  %v2623_v45 = vmul.f32 %v2621_v17, %v2621_v17 }
 0x6c5   : > { %v2624_v46 = vsel %vm584_vm2, %v2622_v44, 0.0  ;;  %v2625_v47 = vsel %vm584_vm2, %v2623_v45, 0.0 }
 0x6c6   : > { %v2626_v49 = vadd.f32 %v2625_v47, %v2624_v46 }
 0x6c8   : > { %v2627_v7 = vrot.slane %v2626_v49, 4 }
 0x6ca   : > { %v2628_v6 = vadd.f32 %v2627_v7, %v2626_v49 }
 0x6cc   : > { %v2629_v25 = vrot.slane %v2628_v6, 2 }
 0x6ce   : > { %v2630_v11 = vadd.f32 %v2629_v25, %v2628_v6 }
 0x6d0   : > { %v2631_v28 = vrot.slane %v2630_v11, 1 }
 0x6d2   : > { %v2632_v23 = vadd.f32 %v2631_v28, %v2630_v11 }
 0x6d4   : > { %v2633_v50 = vmul.f32 0.0625, %v2632_v23 }
 0x6d6   : > { %v2634_v55 = vadd.f32 1e-06, %v2633_v50 }
 0x6d8   : > { %3523 = vrsqrt.f32 %v2634_v55 }
 0x6e2   : > { %v3524_v51 = vpop.eup %3523 }
 0x6e3   : > { %v2636_v24 = vmul.f32 %v3524_v51, %v2620_v59  ;;  %v2637_v27 = vmul.f32 %v3524_v51, %v2621_v17 }
 0x6e5   : > { %v2644_v39 = vmul.f32 %v3056_v53, %v2636_v24  ;;  %v2645_v54 = vmul.f32 %v3056_v53, %v2637_v27 }
 0x6e7   : > { %v2652_v60 = vadd.f32 %v3057_v26, %v2644_v39  ;;  %v2653_v40 = vadd.f32 %v3057_v26, %v2645_v54 }
 0x6e9   : > { %v2654_v61 = vpack.c.bf16 %v2653_v40, %v2652_v60 }
 0x6eb   : > { %3371 = vmatmul.mubr.msk.bf16.vlgmr.msra.gmra.mrb[68].mxu0 %vm584_vm2, %v2654_v61 }
 0x7be   : > { %v2715_v8 = vpop.f32.mrb[68].mxu0 }
 0x7bf   : > { %v2716_v57 = vadd.f32 %v3058_v52, %v2715_v8  ;;  %v3372_v21 = vpop.f32.mrb[69].mxu0 }
 0x7c0   : > { %v2718_v2 = vpop.f32.mrb[70].mxu0 }
 0x7c1   : > { %v2719_v13 = vadd.f32 %v3058_v52, %v2718_v2  ;;  %v3373_v1 = vpop.f32.mrb[71].mxu0  ;;  %v2722_v58 = vmax.f32 %v2716_v57, 0.0 }
 0x7c3   : > { %v2723_v43 = vmax.f32 %v2719_v13, 0.0 }
 0x7c5   : > { %v2724_v41 = vpack.c.bf16 %v2723_v43, %v2722_v58 }
 0x7c7   : > { %3383 = vmatmul.mubr.msk.bf16.vlgmr.msra.gmra.mrb[68].mxu1 %vm2764_vm11, %v2724_v41 }
 0x899   : > { %2814 = sbr.rel (%p3068_p5) target bundleno = 2210 (0x8a2), region = 80 }
 0x89a   : > { %v2802_v18 = vpop.f32.mrb[68].mxu1 }
 0x89b   : > { %v2803_v19 = vadd.f32 %v3062_v3, %v2802_v18  ;;  %v3384_v14 = vpop.f32.mrb[69].mxu1 }
 0x89c   : > { %v2805_v16 = vpop.f32.mrb[70].mxu1 }
 0x89d   : > { %v2809_v20 = vadd.f32 %v2803_v19, %v4212_v4  ;;  %v2806_v22 = vadd.f32 %v3062_v3, %v2805_v16  ;;  %v3385_v63 = vpop.f32.mrb[71].mxu1 }
 0x89f   : > { %v2810_v35 = vadd.f32 %v2806_v22, %v4217_v36  ;;  %2815 = vst.msk [vmem:[%s4297_s13] sm:$0xff] (!%p3068_p5), %vm584_vm2, %v2809_v20 }
 0x8a1   : > { %2816 = vst.msk [vmem:[%s4297_s13 + $0x8] sm:$0xff] %vm584_vm2, %v2810_v35 }
 0x8a2 PF: > { %p3069_p6 = scmp.ne.s32.totalorder %s3631_s26, 1 }
 0x8a3   : > { %v2823_v62 = vsel (!%p3069_p6), %vm584_vm2, %v2809_v20, 0.0  ;;  %v2824_v31 = vsel (!%p3069_p6), %vm584_vm2, %v2810_v35, 0.0  ;;  %v3070_v6 = vld [vmem:[%s4295_s11] ss:$0 sm:$0xff] (!%p3069_p6)  ;;  %s4308_s28 = sld [smem:[#allocation5_spill]] (!%p3069_p6) }
 0x8a4   : > { %2820 = sbr.rel (%p3069_p6) target bundleno = 2269 (0x8dd), region = 84  ;;  %v2825_v4 = vadd.f32 (!%p3069_p6), %v2824_v31, %v2823_v62 }
 0x8a6   : > { %v2826_v29 = vrot.slane (!%p3069_p6), %v2825_v4, 4 }
 0x8a8   : > { %v2827_v30 = vadd.f32 (!%p3069_p6), %v2826_v29, %v2825_v4 }
 0x8a9   : > { %v3071_v28 = vld [vmem:[%s4308_s28] ss:$0 sm:$0xff] (!%p3069_p6) }
 0x8aa   : > { %v2828_v32 = vrot.slane (!%p3069_p6), %v2827_v30, 2 }
 0x8ac   : > { %v2829_v36 = vadd.f32 %v2828_v32, %v2827_v30 }
 0x8ae   : > { %v2830_v37 = vrot.slane %v2829_v36, 1 }
 0x8b0   : > { %v2831_v0 = vadd.f32 %v2830_v37, %v2829_v36 }
 0x8b2   : > { %v2832_v15 = vmul.f32 0.0625, %v2831_v0 }
 0x8b4   : > { %v2833_v9 = vsub.f32 %v2809_v20, %v2832_v15  ;;  %v2834_v48 = vsub.f32 %v2810_v35, %v2832_v15 }
 0x8b6   : > { %v2835_v10 = vmul.f32 %v2833_v9, %v2833_v9  ;;  %v2836_v38 = vmul.f32 %v2834_v48, %v2834_v48 }
 0x8b8   : > { %v2837_v42 = vsel %vm584_vm2, %v2835_v10, 0.0  ;;  %v2838_v5 = vsel %vm584_vm2, %v2836_v38, 0.0 }
 0x8b9   : > { %v2839_v56 = vadd.f32 %v2838_v5, %v2837_v42 }
 0x8bb   : > { %v2840_v12 = vrot.slane %v2839_v56, 4 }
 0x8bd   : > { %v2841_v59 = vadd.f32 %v2840_v12, %v2839_v56 }
 0x8bf   : > { %v2842_v17 = vrot.slane %v2841_v59, 2 }
 0x8c1   : > { %v2843_v44 = vadd.f32 %v2842_v17, %v2841_v59 }
 0x8c3   : > { %v2844_v45 = vrot.slane %v2843_v44, 1 }
 0x8c5   : > { %v2845_v46 = vadd.f32 %v2844_v45, %v2843_v44 }
 0x8c7   : > { %v2846_v47 = vmul.f32 0.0625, %v2845_v46 }
 0x8c9   : > { %v2847_v49 = vadd.f32 1e-06, %v2846_v47 }
 0x8cb   : > { %3527 = vrsqrt.f32 %v2847_v49 }
 0x8d5   : > { %v3528_v7 = vpop.eup %3527 }
 0x8d6   : > { %v2849_v25 = vmul.f32 %v3528_v7, %v2833_v9  ;;  %v2850_v11 = vmul.f32 %v3528_v7, %v2834_v48 }
 0x8d8   : > { %v2857_v23 = vmul.f32 %v3070_v6, %v2849_v25  ;;  %v2858_v50 = vmul.f32 %v3070_v6, %v2850_v11 }
 0x8da   : > { %v2865_v55 = vadd.f32 %v3071_v28, %v2857_v23  ;;  %v2866_v51 = vadd.f32 %v3071_v28, %v2858_v50 }
 0x8dc   : > { %2867 = vst.msk [vmem:[%s4297_s13] sm:$0xff] %vm584_vm2, %v2865_v55  ;;  %2868 = vst.msk [vmem:[%s4297_s13 + $0x8] sm:$0xff] %vm584_vm2, %v2866_v51 }
 0x8dd PF: > { %s4309_s14 = sld [smem:[#allocation2_spill]] }
 0x8e3   : > { %s23_s25 = sadd.s32 1, %s4309_s14  }
 0x8e4   : > { %p20_p7 = scmp.ge.s32.totalorder %s23_s25, 4  }
 0x8e6   :  { %22 = sbr.rel (!%p20_p7) target bundleno = 4 (0x4), region = 137 }

</bundles_post_ra>
